<compile_context>
chip_gen: v7x
topology: tpu7x:2x2x1
jax: 0.10.0
libtpu: 0.0.40
codegen_flags: <defaults>
</compile_context>

<pallas_src>
import functools

import jax
import jax.numpy as jnp
from jax import lax
from jax.experimental import pallas as pl
from jax.experimental.pallas import tpu as pltpu


def _round_up(x, m):
    return ((x + m - 1) // m) * m


# ----------------------------------------------------------------------------
# In-kernel helpers
# ----------------------------------------------------------------------------
def _upsample_rows_2x(x):
    """Nearest 2x along the leading (row) axis: (Hl, W, C) -> (2*Hl, W, C).

    Minor (sublane/lane) dims are untouched, so this is a free broadcast+reshape.
    """
    Hl, W, C = x.shape
    return jnp.broadcast_to(x[:, None, :, :], (Hl, 2, W, C)).reshape(2 * Hl, W, C)


def _conv3x3_bias_relu(x, w_col, bias):
    """3x3 conv (pad=1) + folded-BN bias + ReLU on one spatial plane.

    x:     (H, W, Cin)        f32 value
    w_col: (3, 3*Cin, Cout)   bf16 value, w_col[dx, dy*Cin + c, co] = W[dy, dx, c, co]
    bias:  (1, Cout)          f32 value
    returns (H, W, Cout) f32 post-ReLU.
    """
    H, W, Cin = x.shape
    Cout = w_col.shape[-1]
    Wp = _round_up(W + 2, 8)  # sublane-aligned padded width (>= W + 2)

    # Zero padding.  Column pad is built with wide (8-col) zero slabs plus one
    # shifted slice so the concat pieces stay sublane-tile friendly; row pad is
    # a leading-axis concat (free).
    z8 = jnp.zeros((H, 8, Cin), x.dtype)
    xw = jnp.concatenate([z8, x, z8], axis=1)[:, 7:7 + Wp, :]   # (H, Wp, Cin)
    zrow = jnp.zeros((1, Wp, Cin), x.dtype)
    xpad = jnp.concatenate([zrow, xw, zrow], axis=0)            # (H+2, Wp, Cin)

    # im2col over the dy tap only (leading-axis slices are free):
    #   col[h, w, dy*Cin + c] = xpad[h + dy, w, c]
    col = jnp.concatenate([xpad[dy:dy + H] for dy in range(3)], axis=-1)
    # Wp % 8 == 0 keeps this flatten a pure re-tiling (no sublane padding).
    col2 = col.reshape(H * Wp, 3 * Cin).astype(jnp.bfloat16)

    # One large MXU dot per dx tap: M = H*Wp, K = 3*Cin, f32 accumulation.
    parts = []
    for dx in range(3):
        y = jnp.dot(col2, w_col[dx], preferred_element_type=jnp.float32)
        parts.append(y.reshape(H, Wp, Cout))

    # Apply the dx shift on the partial outputs (2 plane-level shifted adds).
    pre = (parts[0][:, 0:W, :]
           + parts[1][:, 1:W + 1, :]
           + parts[2][:, 2:W + 2, :])
    return jnp.maximum(pre + bias, 0.0)


def _decoder_block_kernel(*refs, n_act):
    """Fused DecoderBlock: row-2x upsample + skip concat + (conv3x3+BN+ReLU) x 2."""
    act_refs = refs[:n_act]
    w1_ref, b1_ref, w2_ref, b2_ref, o_ref = refs[n_act:]

    x = _upsample_rows_2x(act_refs[0][...])                      # (H, W, Cx) f32
    if n_act > 1:
        x = jnp.concatenate([x] + [r[...] for r in act_refs[1:]], axis=-1)

    y = _conv3x3_bias_relu(x, w1_ref[...], b1_ref[...])
    y = _conv3x3_bias_relu(y, w2_ref[...], b2_ref[...])
    o_ref[...] = y.astype(o_ref.dtype)


# ----------------------------------------------------------------------------
# Pallas wrapper: one call per DecoderBlock
# ----------------------------------------------------------------------------
def decoder_block_pallas(params, x, skips):
    """x: (N, Hl, Wl, Cx) NHWC f32 (low-res). skips: list of (N, 2Hl, 2Wl, Cs) f32."""
    N, Hl, Wl, Cx = x.shape
    H, W = 2 * Hl, 2 * Wl

    # Column 2x duplication in the wrapper (half the data volume of a full
    # upsample); row 2x duplication, concat, pad and both convs are fused.
    # TODO(synk): fold the column duplication into the kernel too (needs a
    # sublane interleave / strided store, no cheap Mosaic lowering today).
    x_w = jnp.repeat(x, 2, axis=2)                               # (N, Hl, W, Cx)

    w1c, b1, w2c, b2 = params["w1c"], params["b1"], params["w2c"], params["b2"]
    Cout = w2c.shape[-1]

    in_specs = [pl.BlockSpec((pl.Squeezed(), Hl, W, Cx), lambda n: (n, 0, 0, 0))]
    for s in skips:
        in_specs.append(
            pl.BlockSpec((pl.Squeezed(), H, W, s.shape[-1]),
                         lambda n: (n, 0, 0, 0)))
    in_specs += [
        pl.BlockSpec(w1c.shape, lambda n: (0, 0, 0)),
        pl.BlockSpec(b1.shape, lambda n: (0, 0)),
        pl.BlockSpec(w2c.shape, lambda n: (0, 0, 0)),
        pl.BlockSpec(b2.shape, lambda n: (0, 0)),
    ]
    kernel = functools.partial(_decoder_block_kernel, n_act=1 + len(skips))

    # TODO(synk): add a row-block grid axis (1-row halo) for large H/W or N=1
    # inference so both v7x TensorCores stay busy and tiles stay < 32 MiB.
    return pl.pallas_call(
        kernel,
        out_shape=jax.ShapeDtypeStruct((N, H, W, Cout), jnp.float32),
        grid=(N,),
        in_specs=in_specs,
        out_specs=pl.BlockSpec((pl.Squeezed(), H, W, Cout),
                               lambda n: (n, 0, 0, 0)),
        compiler_params=pltpu.CompilerParams(
            dimension_semantics=("parallel",),
            vmem_limit_bytes=32 * 1024 * 1024),
    )(x_w, *skips, w1c, b1, w2c, b2)


# ----------------------------------------------------------------------------
# Pure-JAX reference path (sanity check only)
# ----------------------------------------------------------------------------
def conv3x3_bn_relu_ref(x, w, b):
    y = lax.conv_general_dilated(
        x, w, window_strides=(1, 1), padding=((1, 1), (1, 1)),
        dimension_numbers=("NHWC", "HWIO", "NHWC"),
        precision=lax.Precision.HIGHEST)
    return jnp.maximum(y + b.reshape(1, 1, 1, -1), 0.0)


def decoder_block_ref(params, x, skips):
    x = jnp.repeat(jnp.repeat(x, 2, axis=1), 2, axis=2)
    if skips:
        x = jnp.concatenate([x] + list(skips), axis=-1)
    x = conv3x3_bn_relu_ref(x, params["w1"], params["b1_vec"])
    x = conv3x3_bn_relu_ref(x, params["w2"], params["b2_vec"])
    return x


# ----------------------------------------------------------------------------
# Parameter construction (Conv3x3 no-bias + eval BatchNorm, folded)
# ----------------------------------------------------------------------------
def _init_conv_bn(key, cin, cout):
    kw, kg, kb, km, kv = jax.random.split(key, 5)
    w = jax.random.normal(kw, (3, 3, cin, cout), jnp.float32) / jnp.sqrt(9.0 * cin)
    gamma = 1.0 + 0.1 * jax.random.normal(kg, (cout,), jnp.float32)
    beta = 0.1 * jax.random.normal(kb, (cout,), jnp.float32)
    mean = 0.1 * jax.random.normal(km, (cout,), jnp.float32)
    var = jnp.abs(1.0 + 0.1 * jax.random.normal(kv, (cout,), jnp.float32))
    scale = gamma / jnp.sqrt(var + 1e-5)
    return w * scale, beta - mean * scale


def _pack_tap_major(w):
    """(3, 3, Cin, Cout) HWIO -> (3, 3*Cin, Cout) bf16, dx major / (dy, c) inner."""
    cin, cout = w.shape[2], w.shape[3]
    return jnp.transpose(w, (1, 0, 2, 3)).reshape(3, 3 * cin, cout).astype(jnp.bfloat16)


class UnetPlusPlusDecoderPallas:
    """Mirrors UnetPlusPlusDecoder (use_batchnorm=True eval, attn=None, center=False)."""

    def __init__(self, key, encoder_channels, decoder_channels):
        enc = list(encoder_channels[1:])[::-1]
        head = enc[0]
        self.in_channels = [head] + list(decoder_channels[:-1])
        self.skip_channels = list(enc[1:]) + [0]
        self.out_channels = list(decoder_channels)
        self.depth = len(self.in_channels) - 1

        specs = {}
        for layer_idx in range(len(self.in_channels) - 1):
            for depth_idx in range(layer_idx + 1):
                if depth_idx == 0:
                    in_ch = self.in_channels[layer_idx]
                    skip_ch = self.skip_channels[layer_idx] * (layer_idx + 1)
                    out_ch = self.out_channels[layer_idx]
                else:
                    out_ch = self.skip_channels[layer_idx]
                    skip_ch = self.skip_channels[layer_idx] * (layer_idx + 1 - depth_idx)
                    in_ch = self.skip_channels[layer_idx - 1]
                specs[f"x_{depth_idx}_{layer_idx}"] = (in_ch, skip_ch, out_ch)
        specs[f"x_0_{len(self.in_channels) - 1}"] = (
            self.in_channels[-1], 0, self.out_channels[-1])

        self.blocks = {}
        for name, (in_ch, skip_ch, out_ch) in specs.items():
            key, k1, k2 = jax.random.split(key, 3)
            w1, b1 = _init_conv_bn(k1, in_ch + skip_ch, out_ch)
            w2, b2 = _init_conv_bn(k2, out_ch, out_ch)
            self.blocks[name] = dict(
                w1=w1, b1_vec=b1, w2=w2, b2_vec=b2,
                w1c=_pack_tap_major(w1), b1=b1.reshape(1, -1).astype(jnp.float32),
                w2c=_pack_tap_major(w2), b2=b2.reshape(1, -1).astype(jnp.float32))

    def __call__(self, *features_nchw, block_fn=decoder_block_pallas):
        # NCHW (PyTorch convention) -> internal NHWC
        feats = [jnp.transpose(f, (0, 2, 3, 1)).astype(jnp.float32)
                 for f in features_nchw]
        feats = feats[1:][::-1]
        dense_x = {}
        for layer_idx in range(len(self.in_channels) - 1):
            for depth_idx in range(self.depth - layer_idx):
                if layer_idx == 0:
                    dense_x[f"x_{depth_idx}_{depth_idx}"] = block_fn(
                        self.blocks[f"x_{depth_idx}_{depth_idx}"],
                        feats[depth_idx], [feats[depth_idx + 1]])
                else:
                    dense_l_i = depth_idx + layer_idx
                    skips = [dense_x[f"x_{idx}_{dense_l_i}"]
                             for idx in range(depth_idx + 1, dense_l_i + 1)]
                    skips = skips + [feats[dense_l_i + 1]]
                    dense_x[f"x_{depth_idx}_{dense_l_i}"] = block_fn(
                        self.blocks[f"x_{depth_idx}_{dense_l_i}"],
                        dense_x[f"x_{depth_idx}_{dense_l_i - 1}"], skips)
        dense_x[f"x_0_{self.depth}"] = block_fn(
            self.blocks[f"x_0_{self.depth}"],
            dense_x[f"x_0_{self.depth - 1}"], [])
        out = dense_x[f"x_0_{self.depth}"]
        return [jnp.transpose(out, (0, 3, 1, 2))]   # back to NCHW


if __name__ == "__main__":
    key = jax.random.PRNGKey(0)
    kp, kf = jax.random.split(key)

    # Small synthetic config: n_blocks = 3
    encoder_channels = (3, 8, 16, 32)
    decoder_channels = (32, 16, 8)
    dec = UnetPlusPlusDecoderPallas(kp, encoder_channels, decoder_channels)

    # Encoder features (NCHW); features[0] is dropped by the decoder forward.
    N = 2
    sizes = [(32, 32), (16, 16), (8, 8), (4, 4)]
    feats = []
    for c, (h, w) in zip(encoder_channels, sizes):
        kf, sub = jax.random.split(kf)
        feats.append(jax.random.normal(sub, (N, c, h, w), jnp.float32))

    out = dec(*feats)[0]
    out = jax.block_until_ready(out)
    assert out.shape == (N, decoder_channels[-1], 32, 32), out.shape
    assert bool(jnp.all(jnp.isfinite(out)))

    # Sanity-check the fused Pallas blocks against an XLA f32 conv reference.
    ref = dec(*feats, block_fn=decoder_block_ref)[0]
    ref = jax.block_until_ready(ref)
    assert bool(jnp.allclose(out, ref, rtol=5e-2, atol=5e-2)), float(
        jnp.max(jnp.abs(out - ref)))

    print("KERNEL_OK")
</pallas_src>

<mosaic_0001>
module attributes {stable_mosaic.version = 11 : i64} {
  func.func @_decoder_block_kernel(%arg0: i32, %arg1: memref<1x4x8x32xf32, #tpu.memory_space<vmem>>, %arg2: memref<1x8x8x16xf32, #tpu.memory_space<vmem>>, %arg3: memref<3x144x32xbf16, #tpu.memory_space<vmem>>, %arg4: memref<1x32xf32, #tpu.memory_space<vmem>>, %arg5: memref<3x96x32xbf16, #tpu.memory_space<vmem>>, %arg6: memref<1x32xf32, #tpu.memory_space<vmem>>, %arg7: memref<1x8x8x32xf32, #tpu.memory_space<vmem>>) attributes {dimension_semantics = [#tpu.dimension_semantics<parallel>], iteration_bounds = array<i64: 2>, scalar_prefetch = 0 : i64, scratch_operands = 0 : i64, tpu.core_type = #tpu.core_type<tc>, window_params = [{transform_indices = @transform_0, window_bounds = array<i64: 1, 4, 8, 32>}, {transform_indices = @transform_1, window_bounds = array<i64: 1, 8, 8, 16>}, {pipeline_mode = #tpu.pipeline_mode<synchronous>, transform_indices = @transform_2, window_bounds = array<i64: 3, 144, 32>}, {pipeline_mode = #tpu.pipeline_mode<synchronous>, transform_indices = @transform_3, window_bounds = array<i64: 1, 32>}, {pipeline_mode = #tpu.pipeline_mode<synchronous>, transform_indices = @transform_4, window_bounds = array<i64: 3, 96, 32>}, {pipeline_mode = #tpu.pipeline_mode<synchronous>, transform_indices = @transform_5, window_bounds = array<i64: 1, 32>}, {transform_indices = @transform_6, window_bounds = array<i64: 1, 8, 8, 32>}]} {
    %c0 = arith.constant 0 : index
    %c0_0 = arith.constant 0 : index
    %c0_1 = arith.constant 0 : index
    %c0_2 = arith.constant 0 : index
    %0 = vector.load %arg1[%c0, %c0_0, %c0_1, %c0_2] : memref<1x4x8x32xf32, #tpu.memory_space<vmem>>, vector<1x4x8x32xf32>
    %1 = vector.shape_cast %0 : vector<1x4x8x32xf32> to vector<4x8x32xf32>
    %2 = vector.shape_cast %1 : vector<4x8x32xf32> to vector<4x1x8x32xf32>
    %3 = vector.shape_cast %2 : vector<4x1x8x32xf32> to vector<4x1x8x32xf32>
    %4 = vector.broadcast %3 : vector<4x1x8x32xf32> to vector<4x2x8x32xf32>
    %5 = vector.shape_cast %4 : vector<4x2x8x32xf32> to vector<8x8x32xf32>
    %c0_3 = arith.constant 0 : index
    %c0_4 = arith.constant 0 : index
    %c0_5 = arith.constant 0 : index
    %c0_6 = arith.constant 0 : index
    %6 = vector.load %arg2[%c0_3, %c0_4, %c0_5, %c0_6] : memref<1x8x8x16xf32, #tpu.memory_space<vmem>>, vector<1x8x8x16xf32>
    %7 = vector.shape_cast %6 : vector<1x8x8x16xf32> to vector<8x8x16xf32>
    %8 = tpu.concatenate %5, %7 in 2 : vector<8x8x32xf32>, vector<8x8x16xf32> -> vector<8x8x48xf32>
    %c0_7 = arith.constant 0 : index
    %c0_8 = arith.constant 0 : index
    %c0_9 = arith.constant 0 : index
    %9 = vector.load %arg3[%c0_7, %c0_8, %c0_9] : memref<3x144x32xbf16, #tpu.memory_space<vmem>>, vector<3x144x32xbf16>
    %c0_10 = arith.constant 0 : index
    %c0_11 = arith.constant 0 : index
    %10 = vector.load %arg4[%c0_10, %c0_11] : memref<1x32xf32, #tpu.memory_space<vmem>>, vector<1x32xf32>
    %cst = arith.constant 0.000000e+00 : f32
    %11 = vector.broadcast %cst : f32 to vector<8x8x48xf32>
    %12 = tpu.concatenate %11, %8, %11 in 1 : vector<8x8x48xf32>, vector<8x8x48xf32>, vector<8x8x48xf32> -> vector<8x24x48xf32>
    %13 = vector.extract_strided_slice %12 {offsets = [0, 7, 0], sizes = [8, 16, 48], strides = [1, 1, 1]} : vector<8x24x48xf32> to vector<8x16x48xf32>
    %cst_12 = arith.constant 0.000000e+00 : f32
    %14 = vector.broadcast %cst_12 : f32 to vector<1x16x48xf32>
    %15 = tpu.concatenate %14, %13, %14 in 0 : vector<1x16x48xf32>, vector<8x16x48xf32>, vector<1x16x48xf32> -> vector<10x16x48xf32>
    %16 = vector.extract_strided_slice %15 {offsets = [0, 0, 0], sizes = [8, 16, 48], strides = [1, 1, 1]} : vector<10x16x48xf32> to vector<8x16x48xf32>
    %17 = vector.extract_strided_slice %15 {offsets = [1, 0, 0], sizes = [8, 16, 48], strides = [1, 1, 1]} : vector<10x16x48xf32> to vector<8x16x48xf32>
    %18 = vector.extract_strided_slice %15 {offsets = [2, 0, 0], sizes = [8, 16, 48], strides = [1, 1, 1]} : vector<10x16x48xf32> to vector<8x16x48xf32>
    %19 = tpu.concatenate %16, %17, %18 in 2 : vector<8x16x48xf32>, vector<8x16x48xf32>, vector<8x16x48xf32> -> vector<8x16x144xf32>
    %20 = vector.shape_cast %19 : vector<8x16x144xf32> to vector<128x144xf32>
    %21 = arith.truncf %20 : vector<128x144xf32> to vector<128x144xbf16>
    %22 = vector.extract_strided_slice %9 {offsets = [0, 0, 0], sizes = [1, 144, 32], strides = [1, 1, 1]} : vector<3x144x32xbf16> to vector<1x144x32xbf16>
    %23 = vector.shape_cast %22 : vector<1x144x32xbf16> to vector<144x32xbf16>
    %cst_13 = arith.constant dense<0.000000e+00> : vector<128x32xf32>
    %24 = tpu.matmul %21, %23, %cst_13 {dimension_numbers = #tpu.dot_dimension_numbers<[1], [0], [0], [1], [0, 0, 1, 1], [], []>} : vector<128x144xbf16>, vector<144x32xbf16>, vector<128x32xf32> -> vector<128x32xf32>
    %25 = vector.shape_cast %24 : vector<128x32xf32> to vector<8x16x32xf32>
    %26 = vector.extract_strided_slice %9 {offsets = [1, 0, 0], sizes = [1, 144, 32], strides = [1, 1, 1]} : vector<3x144x32xbf16> to vector<1x144x32xbf16>
    %27 = vector.shape_cast %26 : vector<1x144x32xbf16> to vector<144x32xbf16>
    %cst_14 = arith.constant dense<0.000000e+00> : vector<128x32xf32>
    %28 = tpu.matmul %21, %27, %cst_14 {dimension_numbers = #tpu.dot_dimension_numbers<[1], [0], [0], [1], [0, 0, 1, 1], [], []>} : vector<128x144xbf16>, vector<144x32xbf16>, vector<128x32xf32> -> vector<128x32xf32>
    %29 = vector.shape_cast %28 : vector<128x32xf32> to vector<8x16x32xf32>
    %30 = vector.extract_strided_slice %9 {offsets = [2, 0, 0], sizes = [1, 144, 32], strides = [1, 1, 1]} : vector<3x144x32xbf16> to vector<1x144x32xbf16>
    %31 = vector.shape_cast %30 : vector<1x144x32xbf16> to vector<144x32xbf16>
    %cst_15 = arith.constant dense<0.000000e+00> : vector<128x32xf32>
    %32 = tpu.matmul %21, %31, %cst_15 {dimension_numbers = #tpu.dot_dimension_numbers<[1], [0], [0], [1], [0, 0, 1, 1], [], []>} : vector<128x144xbf16>, vector<144x32xbf16>, vector<128x32xf32> -> vector<128x32xf32>
    %33 = vector.shape_cast %32 : vector<128x32xf32> to vector<8x16x32xf32>
    %34 = vector.extract_strided_slice %25 {offsets = [0, 0, 0], sizes = [8, 8, 32], strides = [1, 1, 1]} : vector<8x16x32xf32> to vector<8x8x32xf32>
    %35 = vector.extract_strided_slice %29 {offsets = [0, 1, 0], sizes = [8, 8, 32], strides = [1, 1, 1]} : vector<8x16x32xf32> to vector<8x8x32xf32>
    %36 = arith.addf %34, %35 : vector<8x8x32xf32>
    %37 = vector.extract_strided_slice %33 {offsets = [0, 2, 0], sizes = [8, 8, 32], strides = [1, 1, 1]} : vector<8x16x32xf32> to vector<8x8x32xf32>
    %38 = arith.addf %36, %37 : vector<8x8x32xf32>
    %39 = vector.shape_cast %10 : vector<1x32xf32> to vector<1x1x32xf32>
    %40 = vector.broadcast %39 : vector<1x1x32xf32> to vector<8x8x32xf32>
    %41 = arith.addf %38, %40 : vector<8x8x32xf32>
    %cst_16 = arith.constant 0.000000e+00 : f32
    %42 = vector.broadcast %cst_16 : f32 to vector<8x8x32xf32>
    %43 = arith.maximumf %41, %42 : vector<8x8x32xf32>
    %c0_17 = arith.constant 0 : index
    %c0_18 = arith.constant 0 : index
    %c0_19 = arith.constant 0 : index
    %44 = vector.load %arg5[%c0_17, %c0_18, %c0_19] : memref<3x96x32xbf16, #tpu.memory_space<vmem>>, vector<3x96x32xbf16>
    %c0_20 = arith.constant 0 : index
    %c0_21 = arith.constant 0 : index
    %45 = vector.load %arg6[%c0_20, %c0_21] : memref<1x32xf32, #tpu.memory_space<vmem>>, vector<1x32xf32>
    %cst_22 = arith.constant 0.000000e+00 : f32
    %46 = vector.broadcast %cst_22 : f32 to vector<8x8x32xf32>
    %47 = tpu.concatenate %46, %43, %46 in 1 : vector<8x8x32xf32>, vector<8x8x32xf32>, vector<8x8x32xf32> -> vector<8x24x32xf32>
    %48 = vector.extract_strided_slice %47 {offsets = [0, 7, 0], sizes = [8, 16, 32], strides = [1, 1, 1]} : vector<8x24x32xf32> to vector<8x16x32xf32>
    %cst_23 = arith.constant 0.000000e+00 : f32
    %49 = vector.broadcast %cst_23 : f32 to vector<1x16x32xf32>
    %50 = tpu.concatenate %49, %48, %49 in 0 : vector<1x16x32xf32>, vector<8x16x32xf32>, vector<1x16x32xf32> -> vector<10x16x32xf32>
    %51 = vector.extract_strided_slice %50 {offsets = [0, 0, 0], sizes = [8, 16, 32], strides = [1, 1, 1]} : vector<10x16x32xf32> to vector<8x16x32xf32>
    %52 = vector.extract_strided_slice %50 {offsets = [1, 0, 0], sizes = [8, 16, 32], strides = [1, 1, 1]} : vector<10x16x32xf32> to vector<8x16x32xf32>
    %53 = vector.extract_strided_slice %50 {offsets = [2, 0, 0], sizes = [8, 16, 32], strides = [1, 1, 1]} : vector<10x16x32xf32> to vector<8x16x32xf32>
    %54 = tpu.concatenate %51, %52, %53 in 2 : vector<8x16x32xf32>, vector<8x16x32xf32>, vector<8x16x32xf32> -> vector<8x16x96xf32>
    %55 = vector.shape_cast %54 : vector<8x16x96xf32> to vector<128x96xf32>
    %56 = arith.truncf %55 : vector<128x96xf32> to vector<128x96xbf16>
    %57 = vector.extract_strided_slice %44 {offsets = [0, 0, 0], sizes = [1, 96, 32], strides = [1, 1, 1]} : vector<3x96x32xbf16> to vector<1x96x32xbf16>
    %58 = vector.shape_cast %57 : vector<1x96x32xbf16> to vector<96x32xbf16>
    %cst_24 = arith.constant dense<0.000000e+00> : vector<128x32xf32>
    %59 = tpu.matmul %56, %58, %cst_24 {dimension_numbers = #tpu.dot_dimension_numbers<[1], [0], [0], [1], [0, 0, 1, 1], [], []>} : vector<128x96xbf16>, vector<96x32xbf16>, vector<128x32xf32> -> vector<128x32xf32>
    %60 = vector.shape_cast %59 : vector<128x32xf32> to vector<8x16x32xf32>
    %61 = vector.extract_strided_slice %44 {offsets = [1, 0, 0], sizes = [1, 96, 32], strides = [1, 1, 1]} : vector<3x96x32xbf16> to vector<1x96x32xbf16>
    %62 = vector.shape_cast %61 : vector<1x96x32xbf16> to vector<96x32xbf16>
    %cst_25 = arith.constant dense<0.000000e+00> : vector<128x32xf32>
    %63 = tpu.matmul %56, %62, %cst_25 {dimension_numbers = #tpu.dot_dimension_numbers<[1], [0], [0], [1], [0, 0, 1, 1], [], []>} : vector<128x96xbf16>, vector<96x32xbf16>, vector<128x32xf32> -> vector<128x32xf32>
    %64 = vector.shape_cast %63 : vector<128x32xf32> to vector<8x16x32xf32>
    %65 = vector.extract_strided_slice %44 {offsets = [2, 0, 0], sizes = [1, 96, 32], strides = [1, 1, 1]} : vector<3x96x32xbf16> to vector<1x96x32xbf16>
    %66 = vector.shape_cast %65 : vector<1x96x32xbf16> to vector<96x32xbf16>
    %cst_26 = arith.constant dense<0.000000e+00> : vector<128x32xf32>
    %67 = tpu.matmul %56, %66, %cst_26 {dimension_numbers = #tpu.dot_dimension_numbers<[1], [0], [0], [1], [0, 0, 1, 1], [], []>} : vector<128x96xbf16>, vector<96x32xbf16>, vector<128x32xf32> -> vector<128x32xf32>
    %68 = vector.shape_cast %67 : vector<128x32xf32> to vector<8x16x32xf32>
    %69 = vector.extract_strided_slice %60 {offsets = [0, 0, 0], sizes = [8, 8, 32], strides = [1, 1, 1]} : vector<8x16x32xf32> to vector<8x8x32xf32>
    %70 = vector.extract_strided_slice %64 {offsets = [0, 1, 0], sizes = [8, 8, 32], strides = [1, 1, 1]} : vector<8x16x32xf32> to vector<8x8x32xf32>
    %71 = arith.addf %69, %70 : vector<8x8x32xf32>
    %72 = vector.extract_strided_slice %68 {offsets = [0, 2, 0], sizes = [8, 8, 32], strides = [1, 1, 1]} : vector<8x16x32xf32> to vector<8x8x32xf32>
    %73 = arith.addf %71, %72 : vector<8x8x32xf32>
    %74 = vector.shape_cast %45 : vector<1x32xf32> to vector<1x1x32xf32>
    %75 = vector.broadcast %74 : vector<1x1x32xf32> to vector<8x8x32xf32>
    %76 = arith.addf %73, %75 : vector<8x8x32xf32>
    %cst_27 = arith.constant 0.000000e+00 : f32
    %77 = vector.broadcast %cst_27 : f32 to vector<8x8x32xf32>
    %78 = arith.maximumf %76, %77 : vector<8x8x32xf32>
    %c0_28 = arith.constant 0 : index
    %c0_29 = arith.constant 0 : index
    %c0_30 = arith.constant 0 : index
    %c0_31 = arith.constant 0 : index
    %79 = vector.load %arg7[%c0_28, %c0_29, %c0_30, %c0_31] : memref<1x8x8x32xf32, #tpu.memory_space<vmem>>, vector<1x8x8x32xf32>
    %80 = vector.shape_cast %79 : vector<1x8x8x32xf32> to vector<8x8x32xf32>
    %81 = vector.shape_cast %78 : vector<8x8x32xf32> to vector<1x8x8x32xf32>
    tpu.vector_store %arg7[%c0_28, %c0_29, %c0_30, %c0_31], %81 {strides = array<i32>} : memref<1x8x8x32xf32, #tpu.memory_space<vmem>>, vector<1x8x8x32xf32>,
    return
  }
  func.func @transform_0(%arg0: i32) -> (i32, i32, i32, i32) {
    %c0_i32 = arith.constant 0 : i32
    %c0_i32_0 = arith.constant 0 : i32
    %c0_i32_1 = arith.constant 0 : i32
    %c0_i32_2 = arith.constant 0 : i32
    return %arg0, %c0_i32, %c0_i32_0, %c0_i32_1 : i32, i32, i32, i32
  }
  func.func @transform_1(%arg0: i32) -> (i32, i32, i32, i32) {
    %c0_i32 = arith.constant 0 : i32
    %c0_i32_0 = arith.constant 0 : i32
    %c0_i32_1 = arith.constant 0 : i32
    %c0_i32_2 = arith.constant 0 : i32
    return %arg0, %c0_i32, %c0_i32_0, %c0_i32_1 : i32, i32, i32, i32
  }
  func.func @transform_2(%arg0: i32) -> (i32, i32, i32) {
    %c0_i32 = arith.constant 0 : i32
    %c0_i32_0 = arith.constant 0 : i32
    %c0_i32_1 = arith.constant 0 : i32
    %c0_i32_2 = arith.constant 0 : i32
    return %c0_i32, %c0_i32_0, %c0_i32_1 : i32, i32, i32
  }
  func.func @transform_3(%arg0: i32) -> (i32, i32) {
    %c0_i32 = arith.constant 0 : i32
    %c0_i32_0 = arith.constant 0 : i32
    %c0_i32_1 = arith.constant 0 : i32
    return %c0_i32, %c0_i32_0 : i32, i32
  }
  func.func @transform_4(%arg0: i32) -> (i32, i32, i32) {
    %c0_i32 = arith.constant 0 : i32
    %c0_i32_0 = arith.constant 0 : i32
    %c0_i32_1 = arith.constant 0 : i32
    %c0_i32_2 = arith.constant 0 : i32
    return %c0_i32, %c0_i32_0, %c0_i32_1 : i32, i32, i32
  }
  func.func @transform_5(%arg0: i32) -> (i32, i32) {
    %c0_i32 = arith.constant 0 : i32
    %c0_i32_0 = arith.constant 0 : i32
    %c0_i32_1 = arith.constant 0 : i32
    return %c0_i32, %c0_i32_0 : i32, i32
  }
  func.func @transform_6(%arg0: i32) -> (i32, i32, i32, i32) {
    %c0_i32 = arith.constant 0 : i32
    %c0_i32_0 = arith.constant 0 : i32
    %c0_i32_1 = arith.constant 0 : i32
    %c0_i32_2 = arith.constant 0 : i32
    return %arg0, %c0_i32, %c0_i32_0, %c0_i32_1 : i32, i32, i32, i32
  }
}

</mosaic_0001>

<bundles_post_ra>
// kernel: tpu_custom_call.1
= control target key start
LH: loop header
LB: loop body
LE: loop exit
PB: predicated region body
PF: predicated region fallthrough
CT: control target
= control target key end

     0   :  { %11 = vsyncpa [#allocation3], 0  ;;  %s3473_s0 = inlined_call_operand.vmem [shape: f32[2,4,8,32], index: 0, kind: input, shape index: {}]   ;;  %s3474_s1 = inlined_call_operand.vmem [shape: f32[2,8,8,16], index: 1, kind: input, shape index: {}]   ;;  %s3475_s2 = inlined_call_operand.vmem [shape: bf16[3,144,32], index: 2, kind: input, shape index: {}]   ;;  %s3476_s3 = inlined_call_operand.vmem [shape: f32[1,32], index: 3, kind: input, shape index: {}]   ;;  %s3477_s4 = inlined_call_operand.vmem [shape: bf16[3,96,32], index: 4, kind: input, shape index: {}]   ;;  %s3478_s5 = inlined_call_operand.vmem [shape: f32[1,32], index: 5, kind: input, shape index: {}]   ;;  %s3479_s6 = inlined_call_operand.hbm [shape: f32[2,8,8,32], index: 6, kind: output, shape index: {}]  }
   0x1   :  { %13 = vsyncpa [#allocation3 + $0x1], 0  ;;  %s2644_s21 = smov 0   ;;  %s2646_s22 = smov 0  }
   0x2   :  { %s2648_s23 = smov 0   ;;  %s2650_s24 = smov 0  }
   0x3 LB: > { %s2665_s25 = sadd.s32 4294967295, %s2598_s24   ;;  %s2039_s26 = sadd.s32 4294967294, %s2598_s24   ;;  %s2598_s24 = sphi %s2650_s24, %s3485_s24   ;;  %s2594_s23 = sphi %s2648_s23, %s3484_s23   ;;  %s2590_s22 = sphi %s2646_s22, %s3483_s22   ;;  %s2586_s21 = sphi %s2644_s21, %s3482_s21  }
   0x4   : > { %s2669_s27 = sadd.s32 1, %s2598_s24   ;;  %s162_s28 = sadd.s32 1, %s2594_s23 }
   0x5   : > { %s159_s29 = ssub.s32 %s2598_s24, %s2669_s27  ;;  %p172_p0 = scmp.ne.s32.totalorder %s2594_s23, %s2590_s22 }
   0x6   : > { %p160_p1 = scmp.eq.s32.totalorder %s159_s29, 0  ;;  %p173_p2 = scmp.eq.s32.totalorder %s2665_s25, 1 }
   0x7   : > { %p178_p3 = scmp.ne.s32.totalorder %s2590_s22, %s2586_s21  ;;  %p179_p4 = scmp.eq.s32.totalorder %s2039_s26, 1 }
   0x8   : > { %s2680_s30 = scalar_select %p160_p1, %s2594_s23, %s162_s28  }
   0x9   : > { %p2682_p5 = por %p173_p2, %p172_p0  ;;  %p2686_p6 = por %p179_p4, %p178_p3 }
   0xa   : > { %p2042_p7 = scmp.ge.s32.totalorder %s2598_s24, 1  ;;  %p225_p8 = scmp.lt.s32.totalorder %s2598_s24, 3 }
   0xc   : > { %p226_p9 = pnand %p2042_p7, %p225_p8 }
   0xd   : > { %p260_p10 = scmp.lt.s32.totalorder (!%p226_p9), %s2665_s25, 1  ;;  %s2600_s14 = smov (!%p226_p9), 32   ;;  %v2491_v9 = vld [vmem:[%s3475_s2] sm:$0xff] (!%p226_p9)   ;;  %v2492_v10 = vld [vmem:[%s3475_s2 + $0x48] sm:$0xff] (!%p226_p9)   ;;  %v2601_v11 = vmov (!%p226_p9), 0   ;;  %v2494_v13 = vld [vmem:[%s3475_s2 + $0x50] sm:$0xff] (!%p226_p9)  }
   0xe   : > { %229 = sbr.rel (%p226_p9) target bundleno = 1030 (0x406), region = 44  ;;  %650 = vmatprep.subr.bf16.mxu0 (!%p226_p9), %v2601_v11  ;;  %793 = vmatprep.subr.bf16.mxu1 (!%p226_p9), %v2601_v11  ;;  %v2493_v12 = vld [vmem:[%s3475_s2 + $0x8] sm:$0xff] (!%p226_p9)   ;;  %v2495_v14 = vld [vmem:[%s3475_s2 + $0x10] sm:$0xff] (!%p226_p9)   ;;  %v2496_v15 = vld [vmem:[%s3475_s2 + $0x58] sm:$0xff] (!%p226_p9)   ;;  %vm315_vm0 = vcmask (!%p226_p9), 261120   ;;  %v2602_v34 = vmov (!%p226_p9), 0.0  }
   0xf   : > { %651 = vmatpush1.bf16.msra.mxu0 (!%p226_p9), %v2491_v9  ;;  %794 = vmatpush1.bf16.msra.mxu1 (!%p226_p9), %v2492_v10  ;;  %v2497_v16 = vld [vmem:[%s3475_s2 + $0x18] sm:$0xff] (!%p226_p9)   ;;  %v2498_v17 = vld [vmem:[%s3475_s2 + $0x60] sm:$0xff] (!%p226_p9)   ;;  %v2500_v19 = vld [vmem:[%s3475_s2 + $0x68] sm:$0xff] (!%p226_p9)   ;;  %v2789_v35 = vrot.slane (!%p226_p9), %v2602_v34, 7  ;;  %vm388_vm1 = vcmask (!%p226_p9), 1040384   ;;  %s2604_s16 = smov (!%p226_p9), 48  }
  0x10   : > { %652 = vmatprep.subr.bf16.mxu0 (!%p226_p9), %v2601_v11  ;;  %795 = vmatprep.subr.bf16.mxu1 (!%p226_p9), %v2601_v11  ;;  %v2499_v18 = vld [vmem:[%s3475_s2 + $0x20] sm:$0xff] (!%p226_p9)   ;;  %v2501_v20 = vld [vmem:[%s3475_s2 + $0x28] sm:$0xff] (!%p226_p9)   ;;  %v2502_v21 = vld [vmem:[%s3475_s2 + $0x70] sm:$0xff] (!%p226_p9)   ;;  %vm521_vm2 = vcmask (!%p226_p9), 392192   ;;  %vm625_vm3 = vcmask (!%p226_p9), 130048   ;;  %vm538_vm4 = vcmask (!%p226_p9), 785408  }
  0x11   : > { %v2503_v22 = vld [vmem:[%s3475_s2 + $0x30] sm:$0xff] (!%p226_p9)   ;;  %v2504_v23 = vld [vmem:[%s3475_s2 + $0x78] sm:$0xff] (!%p226_p9)   ;;  %v2506_v25 = vld [vmem:[%s3475_s2 + $0x80] sm:$0xff] (!%p226_p9)   ;;  %vm1057_vm5 = vcmask (!%p226_p9), 1046528   ;;  %vm1114_vm6 = vcmask (!%p226_p9), 1045504   ;;  %s2605_s19 = smov (!%p226_p9), 64  }
  0x12   : > { %v2505_v24 = vld [vmem:[%s3475_s2 + $0x38] sm:$0xff] (!%p226_p9)   ;;  %v2507_v26 = vld [vmem:[%s3475_s2 + $0x40] sm:$0xff] (!%p226_p9)   ;;  %v2508_v27 = vld [vmem:[%s3475_s2 + $0x88] sm:$0xff] (!%p226_p9)   ;;  %vm1369_vm7 = vcmask (!%p226_p9), 523264   ;;  %s257_s17 = sand.u32 (!%p226_p9), 1, %s2590_s22  }
  0x13   : > { %653 = vmatpush1.bf16.msra.mxu0 (!%p226_p9), %v2493_v12  ;;  %796 = vmatpush1.bf16.msra.mxu1 (!%p226_p9), %v2494_v13  ;;  %s2043_s20 = sshll.u32 (!%p226_p9), %s257_s17, 6 }
  0x14   : > { %654 = vmatprep.subr.bf16.mxu0 (!%p226_p9), %v2601_v11  ;;  %797 = vmatprep.subr.bf16.mxu1 (!%p226_p9), %v2601_v11 }
  0x15   : > { %s2694_s9 = scalar_select %p260_p10, %s2665_s25, 1 }
  0x17   : > { %s2149_s10 = sshll.u32 %s2694_s9, 6  ;;  %655 = vmatpush1.bf16.msra.mxu0 %v2495_v14  ;;  %798 = vmatpush1.bf16.msra.mxu1 %v2496_v15  ;;  %s2148_s26 = sshll.u32 %s2694_s9, 5 }
  0x18   : > { %s269_s13 = scalar_lea.vmem %s3474_s1, %s2149_s10  ;;  %656 = vmatprep.subr.bf16.mxu0 %v2601_v11  ;;  %799 = vmatprep.subr.bf16.mxu1 %v2601_v11  ;;  %s2777_s10 = scalar_lea.vmem %s3473_s0, %s2148_s26 }
  0x19   : > { %v275_v0 = vld [vmem:[%s269_s13] sm:$0xff]  ;;  %v276_v1 = vld [vmem:[%s269_s13 + $0x8] sm:$0xff]  ;;  %v278_v3 = vld [vmem:[%s269_s13 + $0x18] sm:$0xff]  ;;  %s2603_s9 = smov 96   ;;  %s3386_s26 = scalar_lea.vmem [#allocation2], %s2043_s20 }
  0x1a   : > { %v2336_v2 = vpack.i.bf16 %v276_v1, %v275_v0  ;;  %297 = vrot.lane.b32.xlu1 %v278_v3, %s2600_s14  ;;  %v277_v4 = vld [vmem:[%s269_s13 + $0x10] sm:$0xff]  ;;  %v279_v5 = vld [vmem:[%s269_s13 + $0x20] sm:$0xff]  ;;  %v280_v7 = vld [vmem:[%s269_s13 + $0x28] sm:$0xff]  ;;  %s1965_s28 = sshll.u32 %s3386_s26, 4  ;;  %s3424_s28 = int_to_ptr.vmem [resolvable:$true] %s1965_s28 }
  0x1b   : > { %v281_v6 = vld [vmem:[%s269_s13 + $0x30] sm:$0xff]  ;;  %v282_v8 = vld [vmem:[%s269_s13 + $0x38] sm:$0xff]  ;;  %657 = vmatpush1.bf16.msra.mxu0 %v2497_v16  ;;  %800 = vmatpush1.bf16.msra.mxu1 %v2498_v17  ;;  %v271_v30 = vld [vmem:[%s2777_s10] sm:$0xff]  ;;  %s2536_s12 = scalar_lea.vmem %s3424_s28, 1024  ;;  %s2606_s13 = smov [#allocation2]  }
  0x1c   : > { %2337 = vrot.lane.b32.xlu0 %v2336_v2, %s2600_s14  ;;  %658 = vmatprep.subr.bf16.mxu0 %v2601_v11  ;;  %v272_v33 = vld [vmem:[%s2777_s10 + $0x8] sm:$0xff]  ;;  %v273_v43 = vld [vmem:[%s2777_s10 + $0x10] sm:$0xff]  ;;  %v274_v63 = vld [vmem:[%s2777_s10 + $0x18] sm:$0xff]  ;;  %p2537_p11 = scmp.ne.s32.totalorder %s3424_s28, %s2536_s12  ;;  %s2540_s15 = sshll.u32 %s2606_s13, 4  ;;  %s2541_s15 = int_to_ptr.vmem [resolvable:$false] %s2540_s15 }
  0x1d   : > { %801 = vmatprep.subr.bf16.mxu1 %v2601_v11  ;;  %p2543_p0 = scmp.lt.s32.totalorder %s3424_s28, %s2541_s15 }
  0x1e   : > { %299 = vrot.lane.b32.xlu1 %v279_v5, %s2600_s14  ;;  %p2538_p12 = pnand %p2537_p11, %p2682_p5 }
  0x1f   : > { %659 = vmatpush1.bf16.msra.mxu0 %v2499_v18  ;;  %802 = vmatpush1.bf16.msra.mxu1 %v2500_v19 }
  0x20   : > { %295 = vrot.lane.b32.xlu0 %v277_v4, %s2600_s14  ;;  %660 = vmatprep.subr.bf16.mxu0 %v2601_v11  ;;  %p2539_p13 = pneg %p2538_p12 }
  0x21   : > { %803 = vmatprep.subr.bf16.mxu1 %v2601_v11 }
  0x22   : > { %303 = vrot.lane.b32.xlu1 %v281_v6, %s2600_s14 }
  0x23   : > { %661 = vmatpush1.bf16.msra.mxu0 %v2501_v20  ;;  %804 = vmatpush1.bf16.msra.mxu1 %v2502_v21 }
  0x24   : > { %301 = vrot.lane.b32.xlu0 %v280_v7, %s2600_s14  ;;  %662 = vmatprep.subr.bf16.mxu0 %v2601_v11 }
  0x25   : > { %805 = vmatprep.subr.bf16.mxu1 %v2601_v11 }
  0x27   : > { %663 = vmatpush1.bf16.msra.mxu0 %v2503_v22  ;;  %806 = vmatpush1.bf16.msra.mxu1 %v2504_v23 }
  0x28   : > { %305 = vrot.lane.b32.xlu0 %v282_v8, %s2600_s14  ;;  %664 = vmatprep.subr.bf16.mxu0 %v2601_v11 }
  0x29   : > { %807 = vmatprep.subr.bf16.mxu1 %v2601_v11 }
  0x2b   : > { %665 = vmatpush1.bf16.msra.mxu0 %v2505_v24  ;;  %808 = vmatpush1.bf16.msra.mxu1 %v2506_v25 }
  0x2c   : > { %666 = vmatprep.subr.bf16.mxu0 %v2601_v11  ;;  %809 = vmatprep.subr.bf16.mxu1 %v2601_v11 }
  0x2f   : > { %667 = vmatpush1.bf16.msra.mxu0 %v2507_v26  ;;  %810 = vmatpush1.bf16.msra.mxu1 %v2508_v27 }
  0x30   : > { %944 = vmatprep.subr.bf16.mxu0 %v2601_v11 }
  0x8c   : > { %v298_v28 = vpop.permute.xlu1 %297 }
  0x8d   : > { %v319_v36 = vsel %vm315_vm0, %v272_v33, %v298_v28 }
  0x8e   : > { %v2338_v29 = vpop.permute.xlu0 %2337  ;;  %v399_v45 = vrot.slane %v319_v36, 7 }
  0x8f   : > { %v2340_v31 = vunpack.i.h.bf16 %v2338_v29  ;;  %v2339_v32 = vunpack.i.l.bf16 %v2338_v29 }
  0x90   : > { %v300_v42 = vpop.permute.xlu1 %299  ;;  %v2831_v59 = vsel %vm388_vm1, %v2789_v35, %v399_v45  ;;  %v2835_v60 = vsel %vm388_vm1, %v399_v45, %v2789_v35 }
  0x91   : > { %v316_v37 = vsel %vm315_vm0, %v271_v30, %v2339_v32  ;;  %v317_v38 = vsel %vm315_vm0, %v271_v30, %v2340_v31  ;;  %v320_v52 = vsel %vm315_vm0, %v273_v43, %v300_v42  ;;  %v2366_v0 = vpack.i.bf16 %v2835_v60, %v2831_v59 }
  0x92   : > { %v390_v39 = vrot.slane %v316_v37, 7  ;;  %v393_v40 = vrot.slane %v317_v38, 7  ;;  %v296_v41 = vpop.permute.xlu0 %295  ;;  %v402_v58 = vrot.slane %v320_v52, 7  ;;  %v2509_v37 = vld [vmem:[%s3475_s2 + $0x90] sm:$0xff]  }
  0x93   : > { %v318_v44 = vsel %vm315_vm0, %v272_v33, %v296_v41 }
  0x94   : > { %v396_v46 = vrot.slane %v318_v44, 7  ;;  %v2798_v47 = vsel %vm388_vm1, %v2789_v35, %v393_v40  ;;  %v2802_v48 = vsel %vm388_vm1, %v393_v40, %v2789_v35  ;;  %v2806_v49 = vsel %vm388_vm1, %v2789_v35, %v390_v39  ;;  %v304_v62 = vpop.permute.xlu1 %303 }
  0x95   : > { %v2346_v50 = vpack.i.bf16 %v2802_v48, %v2798_v47  ;;  %v2812_v51 = vsel %vm388_vm1, %v390_v39, %v2789_v35  ;;  %v2845_v2 = vsel %vm388_vm1, %v2789_v35, %v402_v58  ;;  %v2849_v3 = vsel %vm388_vm1, %v402_v58, %v2789_v35 }
  0x96   : > { %v2341_v53 = vpack.i.bf16 %v2812_v51, %v2806_v49  ;;  %v2819_v54 = vsel %vm388_vm1, %v2789_v35, %v396_v46  ;;  %v2823_v55 = vsel %vm388_vm1, %v396_v46, %v2789_v35  ;;  %v302_v56 = vpop.permute.xlu0 %301  ;;  %v322_v4 = vsel %vm315_vm0, %v274_v63, %v304_v62  ;;  %v2510_v46 = vld [vmem:[%s3475_s2 + $0x98] sm:$0xff]  }
  0x97   : > { %2347 = vrot.lane.b32.xlu0 %v2346_v50, %s2603_s9  ;;  %v2356_v57 = vpack.i.bf16 %v2823_v55, %v2819_v54  ;;  %v321_v61 = vsel %vm315_vm0, %v273_v43, %v302_v56  ;;  %v2376_v6 = vpack.i.bf16 %v2849_v3, %v2845_v2  ;;  %v408_v7 = vrot.slane %v322_v4, 7 }
  0x98   : > { %2342 = vrot.lane.b32.xlu1 %v2341_v53, %s2604_s16  ;;  %v405_v1 = vrot.slane %v321_v61, 7  ;;  %v2511_v61 = vld [vmem:[%s3475_s2 + $0xa0] sm:$0xff]  }
  0x99   : > { %v2871_v14 = vsel %vm388_vm1, %v2789_v35, %v408_v7  ;;  %v2875_v15 = vsel %vm388_vm1, %v408_v7, %v2789_v35 }
  0x9a   : > { %v306_v5 = vpop.permute.xlu0 %305  ;;  %v2858_v8 = vsel %vm388_vm1, %v2789_v35, %v405_v1  ;;  %v2862_v9 = vsel %vm388_vm1, %v405_v1, %v2789_v35  ;;  %v2396_v16 = vpack.i.bf16 %v2875_v15, %v2871_v14 }
  0x9b   : > { %2357 = vrot.lane.b32.xlu0 %v2356_v57, %s2603_s9  ;;  %v323_v10 = vsel %vm315_vm0, %v274_v63, %v306_v5  ;;  %v2386_v12 = vpack.i.bf16 %v2862_v9, %v2858_v8 }
  0x9c   : > { %2352 = vrot.lane.b32.xlu1 %v2346_v50, %s2604_s16  ;;  %v411_v13 = vrot.slane %v323_v10, 7 }
  0x9e   : > { %v412_v17 = vsel %vm388_vm1, %v2789_v35, %v411_v13  ;;  %v413_v18 = vsel %vm388_vm1, %v411_v13, %v2789_v35 }
  0x9f   : > { %2367 = vrot.lane.b32.xlu0 %v2366_v0, %s2603_s9  ;;  %v2406_v19 = vpack.i.bf16 %v413_v18, %v412_v17 }
  0xa0   : > { %2362 = vrot.lane.b32.xlu1 %v2356_v57, %s2604_s16 }
  0xa3   : > { %2377 = vrot.lane.b32.xlu0 %v2376_v6, %s2603_s9 }
  0xa4   : > { %2372 = vrot.lane.b32.xlu1 %v2366_v0, %s2604_s16 }
  0xa7   : > { %2387 = vrot.lane.b32.xlu0 %v2386_v12, %s2603_s9 }
  0xa8   : > { %2382 = vrot.lane.b32.xlu1 %v2376_v6, %s2604_s16 }
  0xab   : > { %2397 = vrot.lane.b32.xlu0 %v2396_v16, %s2603_s9 }
  0xac   : > { %2392 = vrot.lane.b32.xlu1 %v2386_v12, %s2604_s16 }
  0xaf   : > { %2407 = vrot.lane.b32.xlu0 %v2406_v19, %s2603_s9 }
  0xb0   : > { %2402 = vrot.lane.b32.xlu1 %v2396_v16, %s2604_s16  ;;  %v2513_v16 = vld [vmem:[%s3475_s2 + $0xb0] sm:$0xff]  }
  0xb3   : > { %504 = vrot.lane.b32.xlu0 %v2602_v34, %s2603_s9  ;;  %s2542_s9 = scalar_lea.vmem %s2541_s15, 2048 }
  0xb4   : > { %2412 = vrot.lane.b32.xlu1 %v2406_v19, %s2604_s16  ;;  %p2544_p1 = scmp.lt.s32.totalorder %s2542_s9, %s2536_s12 }
  0xb6   : > { %p2545_p2 = por %p2544_p1, %p2543_p0 }
  0xb8   : > { %p2546_p3 = pnand %p2545_p2, %p2539_p13 }
 0x109   : > { %v2348_v20 = vpop.permute.xlu0 %2347 }
 0x10a   : > { %v2350_v21 = vunpack.i.h.bf16 %v2348_v20  ;;  %v2349_v22 = vunpack.i.l.bf16 %v2348_v20  ;;  %v2343_v23 = vpop.permute.xlu1 %2342 }
 0x10b   : > { %v2345_v24 = vunpack.i.h.bf16 %v2343_v23  ;;  %v2344_v25 = vunpack.i.l.bf16 %v2343_v23 }
 0x10c   : > { %v2892_v26 = vpack.c.bf16 %v2350_v21, %v2349_v22 }
 0x10d   : > { %v523_v27 = vsel %vm521_vm2, 0.0, %v2345_v24  ;;  %v522_v28 = vsel %vm521_vm2, 0.0, %v2344_v25  ;;  %v2358_v29 = vpop.permute.xlu0 %2357 }
 0x10e   : > { %v2353_v30 = vpop.permute.xlu1 %2352  ;;  %v2360_v31 = vunpack.i.h.bf16 %v2358_v29  ;;  %v2359_v32 = vunpack.i.l.bf16 %v2358_v29  ;;  %2057 = vmatprep.mubr.msk.bf16.mxu0 %vm625_vm3, %v2892_v26  ;;  %2074 = vmatprep.mubr.msk.bf16.mxu1 %vm625_vm3, %v2892_v26  ;;  %v539_v33 = vsel %vm538_vm4, %v522_v28, %v2349_v22  ;;  %v540_v36 = vsel %vm538_vm4, %v523_v27, %v2350_v21  ;;  %v2515_v29 = vld [vmem:[%s3475_s2 + $0xc0] sm:$0xff]  }
 0x10f   : > { %v2355_v38 = vunpack.i.h.bf16 %v2353_v30  ;;  %v2354_v39 = vunpack.i.l.bf16 %v2353_v30  ;;  %v2905_v40 = vpack.c.bf16 %v540_v36, %v539_v33 }
 0x110   : > { %v2907_v41 = vpack.c.bf16 %v2360_v31, %v2359_v32 }
 0x111   : > { %v525_v42 = vsel %vm521_vm2, %v2812_v51, %v2355_v38  ;;  %v524_v43 = vsel %vm521_vm2, %v2806_v49, %v2354_v39  ;;  %683 = vmatmul.mubr.bf16.vlgmr.msra.gmra.mrb[0].mxu0 %v2905_v40  ;;  %826 = vmatmul.mubr.bf16.vlgmr.msra.gmra.mrb[0].mxu1 %v2905_v40  ;;  %v2368_v44 = vpop.permute.xlu0 %2367 }
 0x112   : > { %945 = vmatpush1.bf16.msra.mxu0 %v2509_v37  ;;  %v2363_v45 = vpop.permute.xlu1 %2362  ;;  %2058 = vmatprep.mubr.msk.bf16.mxu0 %vm625_vm3, %v2907_v41  ;;  %v2370_v49 = vunpack.i.h.bf16 %v2368_v44  ;;  %v2369_v50 = vunpack.i.l.bf16 %v2368_v44  ;;  %v541_v51 = vsel %vm538_vm4, %v524_v43, %v2359_v32  ;;  %v542_v52 = vsel %vm538_vm4, %v525_v42, %v2360_v31 }
 0x113   : > { %2075 = vmatprep.mubr.msk.bf16.mxu1 %vm625_vm3, %v2907_v41  ;;  %946 = vmatprep.subr.bf16.mxu0 %v2601_v11  ;;  %v2365_v53 = vunpack.i.h.bf16 %v2363_v45  ;;  %v2364_v56 = vunpack.i.l.bf16 %v2363_v45  ;;  %v2927_v58 = vpack.c.bf16 %v542_v52, %v541_v51  ;;  %v2517_v45 = vld [vmem:[%s3475_s2 + $0xd0] sm:$0xff]  }
 0x114   : > { %v2925_v57 = vpack.c.bf16 %v2370_v49, %v2369_v50 }
 0x115   : > { %v527_v62 = vsel %vm521_vm2, %v2802_v48, %v2365_v53  ;;  %v526_v63 = vsel %vm521_vm2, %v2798_v47, %v2364_v56  ;;  %v2378_v0 = vpop.permute.xlu0 %2377  ;;  %v2512_v48 = vld [vmem:[%s3475_s2 + $0xa8] sm:$0xff]  }
 0x116   : > { %947 = vmatpush1.bf16.msra.mxu0 %v2510_v46  ;;  %v2373_v1 = vpop.permute.xlu1 %2372  ;;  %v2380_v4 = vunpack.i.h.bf16 %v2378_v0  ;;  %v2379_v5 = vunpack.i.l.bf16 %v2378_v0  ;;  %v543_v47 = vsel %vm538_vm4, %v526_v63, %v2369_v50  ;;  %v544_v6 = vsel %vm538_vm4, %v527_v62, %v2370_v49 }
 0x117   : > { %948 = vmatprep.subr.bf16.mxu0 %v2601_v11  ;;  %v2375_v7 = vunpack.i.h.bf16 %v2373_v1  ;;  %v2374_v10 = vunpack.i.l.bf16 %v2373_v1  ;;  %v2951_v13 = vpack.c.bf16 %v544_v6, %v543_v47 }
 0x118   : > { %v2949_v12 = vpack.c.bf16 %v2380_v4, %v2379_v5 }
 0x119   : > { %690 = vmatmul.mubr.bf16.gmra.mrb[4].mxu0 %v2927_v58  ;;  %834 = vmatmul.mubr.bf16.gmra.mrb[4].mxu1 %v2927_v58  ;;  %v529_v17 = vsel %vm521_vm2, %v2823_v55, %v2375_v7  ;;  %v528_v18 = vsel %vm521_vm2, %v2819_v54, %v2374_v10  ;;  %v2388_v19 = vpop.permute.xlu0 %2387  ;;  %v2514_v55 = vld [vmem:[%s3475_s2 + $0xb8] sm:$0xff]  }
 0x11a   : > { %2059 = vmatprep.mubr.msk.bf16.mxu0 %vm625_vm3, %v2925_v57  ;;  %2076 = vmatprep.mubr.msk.bf16.mxu1 %vm625_vm3, %v2925_v57  ;;  %v2383_v20 = vpop.permute.xlu1 %2382  ;;  %v2390_v21 = vunpack.i.h.bf16 %v2388_v19  ;;  %v2389_v22 = vunpack.i.l.bf16 %v2388_v19  ;;  %v545_v54 = vsel %vm538_vm4, %v528_v18, %v2379_v5  ;;  %v546_v23 = vsel %vm538_vm4, %v529_v17, %v2380_v4 }
 0x11b   : > { %949 = vmatpush1.bf16.msra.mxu0 %v2511_v61  ;;  %v2385_v24 = vunpack.i.h.bf16 %v2383_v20  ;;  %v2384_v25 = vunpack.i.l.bf16 %v2383_v20  ;;  %v2975_v28 = vpack.c.bf16 %v546_v23, %v545_v54 }
 0x11c   : > { %950 = vmatprep.subr.bf16.mxu0 %v2601_v11  ;;  %v2973_v27 = vpack.c.bf16 %v2390_v21, %v2389_v22 }
 0x11d   : > { %v531_v30 = vsel %vm521_vm2, %v2835_v60, %v2385_v24  ;;  %v530_v31 = vsel %vm521_vm2, %v2831_v59, %v2384_v25  ;;  %v2398_v32 = vpop.permute.xlu0 %2397  ;;  %v2516_v60 = vld [vmem:[%s3475_s2 + $0xc8] sm:$0xff]  }
 0x11e   : > { %v2393_v33 = vpop.permute.xlu1 %2392  ;;  %v2400_v36 = vunpack.i.h.bf16 %v2398_v32  ;;  %v2399_v37 = vunpack.i.l.bf16 %v2398_v32  ;;  %v547_v59 = vsel %vm538_vm4, %v530_v31, %v2389_v22  ;;  %v548_v38 = vsel %vm538_vm4, %v531_v30, %v2390_v21  ;;  %v2518_v32 = vld [vmem:[%s3477_s4] sm:$0xff]  }
 0x11f   : > { %951 = vmatpush1.bf16.msra.mxu0 %v2512_v48  ;;  %v2395_v39 = vunpack.i.h.bf16 %v2393_v33  ;;  %v2394_v42 = vunpack.i.l.bf16 %v2393_v33  ;;  %v563_v44 = vpack.c.bf16 %v548_v38, %v547_v59  ;;  %v2519_v33 = vld [vmem:[%s3477_s4 + $0x8] sm:$0xff]   ;;  %2193 = vmatprep.subr.bf16.mxu1 %v2518_v32 }
 0x120   : > { %952 = vmatprep.subr.bf16.mxu0 %v2601_v11  ;;  %v566_v43 = vpack.c.bf16 %v2400_v36, %v2399_v37  ;;  %2194 = vmatpush3.bf16.msra.mxu1 %v2518_v32 }
 0x121   : > { %697 = vmatmul.mubr.bf16.gmra.mrb[8].mxu0 %v2951_v13  ;;  %842 = vmatmul.mubr.bf16.gmra.mrb[8].mxu1 %v2951_v13  ;;  %v533_v46 = vsel %vm521_vm2, %v2849_v3, %v2395_v39  ;;  %v532_v49 = vsel %vm521_vm2, %v2845_v2, %v2394_v42  ;;  %v2408_v50 = vpop.permute.xlu0 %2407  ;;  %v2520_v42 = vld [vmem:[%s3477_s4 + $0x10] sm:$0xff]  }
 0x122   : > { %2060 = vmatprep.mubr.msk.bf16.mxu0 %vm625_vm3, %v2949_v12  ;;  %2077 = vmatprep.mubr.msk.bf16.mxu1 %vm625_vm3, %v2949_v12  ;;  %v2403_v51 = vpop.permute.xlu1 %2402  ;;  %v2410_v52 = vunpack.i.h.bf16 %v2408_v50  ;;  %v2409_v53 = vunpack.i.l.bf16 %v2408_v50  ;;  %v549_v56 = vsel %vm538_vm4, %v532_v49, %v2399_v37 }
 0x123   : > { %953 = vmatpush1.bf16.msra.mxu0 %v2513_v16  ;;  %v2405_v61 = vunpack.i.h.bf16 %v2403_v51  ;;  %v2404_v3 = vunpack.i.l.bf16 %v2403_v51  ;;  %2195 = vmatprep.subr.bf16.mxu1 %v2519_v33 }
 0x124   : > { %954 = vmatprep.subr.bf16.mxu0 %v2601_v11  ;;  %v568_v62 = vpack.c.bf16 %v2410_v52, %v2409_v53  ;;  %2196 = vmatpush3.bf16.msra.mxu1 %v2519_v33 }
 0x125   : > { %v535_v2 = vsel %vm521_vm2, %v2862_v9, %v2405_v61  ;;  %v534_v0 = vsel %vm521_vm2, %v2858_v8, %v2404_v3  ;;  %v505_v6 = vpop.permute.xlu0 %504  ;;  %2197 = vmatprep.subr.bf16.mxu1 %v2520_v42 }
 0x126   : > { %v2413_v1 = vpop.permute.xlu1 %2412  ;;  %v551_v48 = vsel %vm538_vm4, %v534_v0, %v2409_v53  ;;  %v552_v4 = vsel %vm538_vm4, %v535_v2, %v2410_v52  ;;  %v570_v7 = vpack.c.bf16 %v505_v6, %v505_v6 }
 0x127   : > { %955 = vmatpush1.bf16.msra.mxu0 %v2514_v55  ;;  %v2415_v5 = vunpack.i.h.bf16 %v2413_v1  ;;  %v2414_v47 = vunpack.i.l.bf16 %v2413_v1  ;;  %v567_v10 = vpack.c.bf16 %v552_v4, %v551_v48 }
 0x128   : > { %956 = vmatprep.subr.bf16.mxu0 %v2601_v11  ;;  %2198 = vmatpush3.bf16.msra.mxu1 %v2520_v42 }
 0x129   : > { %704 = vmatmul.mubr.bf16.gmra.mrb[12].mxu0 %v2975_v28  ;;  %850 = vmatmul.mubr.bf16.gmra.mrb[12].mxu1 %v2975_v28  ;;  %v536_v9 = vsel %vm521_vm2, %v2871_v14, %v2414_v47  ;;  %v537_v8 = vsel %vm521_vm2, %v2875_v15, %v2415_v5 }
 0x12a   : > { %2061 = vmatprep.mubr.msk.bf16.mxu0 %vm625_vm3, %v2973_v27  ;;  %2078 = vmatprep.mubr.msk.bf16.mxu1 %vm625_vm3, %v2973_v27  ;;  %v553_v16 = vsel %vm538_vm4, %v536_v9, %v505_v6  ;;  %v554_v17 = vsel %vm538_vm4, %v537_v8, %v505_v6 }
 0x12b   : > { %957 = vmatpush1.bf16.msra.mxu0 %v2515_v29  ;;  %v569_v18 = vpack.c.bf16 %v554_v17, %v553_v16 }
 0x12c   : > { %958 = vmatprep.subr.bf16.mxu0 %v2601_v11 }
 0x12f   : > { %959 = vmatpush1.bf16.msra.mxu0 %v2516_v60 }
 0x130   : > { %960 = vmatprep.subr.bf16.mxu0 %v2601_v11  ;;  %v550_v11 = vsel %vm538_vm4, %v533_v46, %v2400_v36  ;;  %v3057_v36 = vld [vmem:[%s3477_s4 + $0x60] sm:$0xff]  }
 0x131   : > { %711 = vmatmul.mubr.bf16.gmra.mrb[16].mxu0 %v563_v44  ;;  %858 = vmatmul.mubr.bf16.gmra.mrb[16].mxu1 %v563_v44  ;;  %v565_v63 = vpack.c.bf16 %v550_v11, %v549_v56 }
 0x132   : > { %2062 = vmatprep.mubr.msk.bf16.mxu0 %vm625_vm3, %v566_v43  ;;  %2079 = vmatprep.mubr.msk.bf16.mxu1 %vm625_vm3, %v566_v43 }
 0x133   : > { %961 = vmatpush1.bf16.msra.mxu0 %v2517_v45 }
 0x134   : > { %2249 = vmatprep.subr.bf16.mxu0 %v3057_v36 }
 0x139   : > { %718 = vmatmul.mubr.bf16.gmra.mrb[20].mxu0 %v565_v63  ;;  %866 = vmatmul.mubr.bf16.gmra.mrb[20].mxu1 %v565_v63 }
 0x13a   : > { %2063 = vmatprep.mubr.msk.bf16.mxu0 %vm625_vm3, %v568_v62  ;;  %2080 = vmatprep.mubr.msk.bf16.mxu1 %vm625_vm3, %v568_v62 }
 0x141   : > { %725 = vmatmul.mubr.bf16.gmra.mrb[24].mxu0 %v567_v10  ;;  %874 = vmatmul.mubr.bf16.gmra.mrb[24].mxu1 %v567_v10 }
 0x142   : > { %2064 = vmatprep.mubr.msk.bf16.mxu0 %vm625_vm3, %v570_v7  ;;  %2081 = vmatprep.mubr.msk.bf16.mxu1 %vm625_vm3, %v570_v7 }
 0x149   : > { %732 = vmatmul.mubr.bf16.gmra.mrb[28].mxu0 %v569_v18  ;;  %882 = vmatmul.mubr.bf16.gmra.mrb[28].mxu1 %v569_v18 }
 0x14a   : > { %2091 = vmatprep.mubr.msk.bf16.mxu0 %vm625_vm3, %v2892_v26 }
 0x151   : > { %977 = vmatmul.mubr.bf16.vlgmr.msra.gmra.mrb[32].mxu0 %v2905_v40 }
 0x152   : > { %2092 = vmatprep.mubr.msk.bf16.mxu0 %vm625_vm3, %v2907_v41  ;;  %2250 = vmatpush3.bf16.msra.mxu0 %v3057_v36 }
 0x159   : > { %985 = vmatmul.mubr.bf16.gmra.mrb[36].mxu0 %v2927_v58 }
 0x15a   : > { %2093 = vmatprep.mubr.msk.bf16.mxu0 %vm625_vm3, %v2925_v57 }
 0x161   : > { %993 = vmatmul.mubr.bf16.gmra.mrb[40].mxu0 %v2951_v13 }
 0x162   : > { %2094 = vmatprep.mubr.msk.bf16.mxu0 %vm625_vm3, %v2949_v12 }
 0x169   : > { %1001 = vmatmul.mubr.bf16.gmra.mrb[44].mxu0 %v2975_v28 }
 0x16a   : > { %2095 = vmatprep.mubr.msk.bf16.mxu0 %vm625_vm3, %v2973_v27 }
 0x171   : > { %1009 = vmatmul.mubr.bf16.gmra.mrb[48].mxu0 %v563_v44 }
 0x172   : > { %2096 = vmatprep.mubr.msk.bf16.mxu0 %vm625_vm3, %v566_v43 }
 0x179   : > { %1017 = vmatmul.mubr.bf16.gmra.mrb[52].mxu0 %v565_v63 }
 0x17a   : > { %2097 = vmatprep.mubr.msk.bf16.mxu0 %vm625_vm3, %v568_v62 }
 0x181   : > { %1025 = vmatmul.mubr.bf16.gmra.mrb[56].mxu0 %v567_v10 }
 0x182   : > { %2098 = vmatprep.mubr.msk.bf16.mxu0 %vm625_vm3, %v570_v7 }
 0x189   : > { %1033 = vmatmul.mubr.bf16.gmra.mrb[60].mxu0 %v569_v18 }
 0x1e4   : > { %v684_v14 = vpop.f32.mrb[0].mxu0  ;;  %v827_v15 = vpop.f32.mrb[0].mxu1 }
 0x1e5   : > { %v686_v26 = vpop.f32.mrb[1].mxu0  ;;  %v829_v40 = vpop.f32.mrb[1].mxu1  ;;  %v1058_v58 = vrot.slane %v827_v15, 1 }
 0x1e6   : > { %v687_v41 = vpop.f32.mrb[2].mxu0  ;;  %v830_v57 = vpop.f32.mrb[2].mxu1 }
 0x1e7   : > { %v1059_v12 = vrot.slane %v830_v57, 1  ;;  %v688_v13 = vpop.f32.mrb[3].mxu0  ;;  %v832_v19 = vpop.f32.mrb[3].mxu1 }
 0x1e9   : > { %v1060_v20 = vsel %vm1057_vm5, %v1058_v58, %v1059_v12 }
 0x1ea   : > { %v3043_v55 = vadd.f32 %v1060_v20, %v684_v14 }
 0x1ec   : > { %v691_v21 = vpop.f32.mrb[4].mxu0  ;;  %v835_v22 = vpop.f32.mrb[4].mxu1 }
 0x1ed   : > { %v693_v54 = vpop.f32.mrb[5].mxu0  ;;  %v837_v23 = vpop.f32.mrb[5].mxu1  ;;  %v1061_v27 = vrot.slane %v835_v22, 1 }
 0x1ee   : > { %v694_v24 = vpop.f32.mrb[6].mxu0  ;;  %v838_v25 = vpop.f32.mrb[6].mxu1 }
 0x1ef   : > { %v1062_v28 = vrot.slane %v838_v25, 1  ;;  %v695_v29 = vpop.f32.mrb[7].mxu0  ;;  %v840_v30 = vpop.f32.mrb[7].mxu1 }
 0x1f1   : > { %v1063_v31 = vsel %vm1057_vm5, %v1061_v27, %v1062_v28 }
 0x1f2   : > { %v3052_v60 = vadd.f32 %v1063_v31, %v691_v21 }
 0x1f4   : > { %v698_v37 = vpop.f32.mrb[8].mxu0  ;;  %v843_v59 = vpop.f32.mrb[8].mxu1 }
 0x1f5   : > { %v700_v38 = vpop.f32.mrb[9].mxu0  ;;  %v845_v39 = vpop.f32.mrb[9].mxu1  ;;  %v1064_v45 = vrot.slane %v843_v59, 1 }
 0x1f6   : > { %v701_v43 = vpop.f32.mrb[10].mxu0  ;;  %v846_v44 = vpop.f32.mrb[10].mxu1 }
 0x1f7   : > { %v1065_v46 = vrot.slane %v846_v44, 1  ;;  %v702_v49 = vpop.f32.mrb[11].mxu0  ;;  %v848_v50 = vpop.f32.mrb[11].mxu1 }
 0x1f9   : > { %v1066_v51 = vsel %vm1057_vm5, %v1064_v45, %v1065_v46 }
 0x1fa   : > { %v3065_v52 = vadd.f32 %v1066_v51, %v698_v37 }
 0x1fc   : > { %v705_v53 = vpop.f32.mrb[12].mxu0  ;;  %v851_v56 = vpop.f32.mrb[12].mxu1 }
 0x1fd   : > { %v707_v11 = vpop.f32.mrb[13].mxu0  ;;  %v853_v61 = vpop.f32.mrb[13].mxu1  ;;  %v1067_v63 = vrot.slane %v851_v56, 1 }
 0x1fe   : > { %v708_v3 = vpop.f32.mrb[14].mxu0  ;;  %v854_v62 = vpop.f32.mrb[14].mxu1 }
 0x1ff   : > { %v1068_v2 = vrot.slane %v854_v62, 1  ;;  %v709_v0 = vpop.f32.mrb[15].mxu0  ;;  %v856_v1 = vpop.f32.mrb[15].mxu1 }
 0x200   : > { %v3085_v0 = vld [vmem:[%s3477_s4 + $0x68] sm:$0xff]   ;;  %v3090_v1 = vld [vmem:[%s3476_s3] ss:$0 sm:$0xff] }
 0x201   : > { %v1069_v48 = vsel %vm1057_vm5, %v1067_v63, %v1068_v2  ;;  %2251 = vmatprep.subr.bf16.mxu0 %v3085_v0 }
 0x202   : > { %v3068_v4 = vadd.f32 %v1069_v48, %v705_v53  ;;  %2252 = vmatpush3.bf16.msra.mxu0 %v3085_v0 }
 0x204   : > { %v712_v5 = vpop.f32.mrb[16].mxu0  ;;  %v859_v47 = vpop.f32.mrb[16].mxu1 }
 0x205   : > { %v714_v6 = vpop.f32.mrb[17].mxu0  ;;  %v861_v7 = vpop.f32.mrb[17].mxu1  ;;  %v1070_v8 = vrot.slane %v859_v47, 1  ;;  %v3099_v47 = vld [vmem:[%s3477_s4 + $0x70] sm:$0xff]  }
 0x206   : > { %v715_v10 = vpop.f32.mrb[18].mxu0  ;;  %v862_v9 = vpop.f32.mrb[18].mxu1  ;;  %v2524_v6 = vld [vmem:[%s3477_s4 + $0x18] sm:$0xff]   ;;  %2253 = vmatprep.subr.bf16.mxu0 %v3099_v47 }
 0x207   : > { %v1071_v16 = vrot.slane %v862_v9, 1  ;;  %v716_v17 = vpop.f32.mrb[19].mxu0  ;;  %v864_v18 = vpop.f32.mrb[19].mxu1  ;;  %2199 = vmatprep.subr.bf16.mxu1 %v2524_v6  ;;  %2254 = vmatpush3.bf16.msra.mxu0 %v3099_v47 }
 0x208   : > { %2200 = vmatpush3.bf16.msra.mxu1 %v2524_v6 }
 0x209   : > { %v1072_v14 = vsel %vm1057_vm5, %v1070_v8, %v1071_v16 }
 0x20a   : > { %v3071_v15 = vadd.f32 %v1072_v14, %v712_v5  ;;  %v3110_v14 = vld [vmem:[%s3477_s4 + $0x78] sm:$0xff]  }
 0x20b   : > { %2255 = vmatprep.subr.bf16.mxu0 %v3110_v14 }
 0x20c   : > { %v719_v26 = vpop.f32.mrb[20].mxu0  ;;  %v867_v40 = vpop.f32.mrb[20].mxu1  ;;  %2256 = vmatpush3.bf16.msra.mxu0 %v3110_v14 }
 0x20d   : > { %v721_v41 = vpop.f32.mrb[21].mxu0  ;;  %v869_v57 = vpop.f32.mrb[21].mxu1  ;;  %v1073_v13 = vrot.slane %v867_v40, 1 }
 0x20e   : > { %v722_v58 = vpop.f32.mrb[22].mxu0  ;;  %v870_v12 = vpop.f32.mrb[22].mxu1 }
 0x20f   : > { %v1074_v19 = vrot.slane %v870_v12, 1  ;;  %v723_v20 = vpop.f32.mrb[23].mxu0  ;;  %v872_v21 = vpop.f32.mrb[23].mxu1 }
 0x211   : > { %v1075_v22 = vsel %vm1057_vm5, %v1073_v13, %v1074_v19  ;;  %v2526_v13 = vld [vmem:[%s3477_s4 + $0x20] sm:$0xff]  }
 0x212   : > { %v3074_v54 = vadd.f32 %v1075_v22, %v719_v26  ;;  %2201 = vmatprep.subr.bf16.mxu1 %v2526_v13 }
 0x213   : > { %2202 = vmatpush3.bf16.msra.mxu1 %v2526_v13 }
 0x214   : > { %v726_v23 = vpop.f32.mrb[24].mxu0  ;;  %v875_v24 = vpop.f32.mrb[24].mxu1 }
 0x215   : > { %v728_v25 = vpop.f32.mrb[25].mxu0  ;;  %v877_v27 = vpop.f32.mrb[25].mxu1  ;;  %v1076_v30 = vrot.slane %v875_v24, 1 }
 0x216   : > { %v729_v28 = vpop.f32.mrb[26].mxu0  ;;  %v878_v29 = vpop.f32.mrb[26].mxu1 }
 0x217   : > { %v1077_v31 = vrot.slane %v878_v29, 1  ;;  %v730_v32 = vpop.f32.mrb[27].mxu0  ;;  %v880_v33 = vpop.f32.mrb[27].mxu1  ;;  %v2528_v28 = vld [vmem:[%s3477_s4 + $0x28] sm:$0xff]  }
 0x218   : > { %v3144_v29 = vld [vmem:[%s3477_s4 + $0x88] sm:$0xff]   ;;  %2203 = vmatprep.subr.bf16.mxu1 %v2528_v28 }
 0x219   : > { %v1078_v37 = vsel %vm1057_vm5, %v1076_v30, %v1077_v31  ;;  %2204 = vmatpush3.bf16.msra.mxu1 %v2528_v28 }
 0x21a   : > { %v3077_v59 = vadd.f32 %v1078_v37, %v726_v23 }
 0x21c   : > { %v733_v38 = vpop.f32.mrb[28].mxu0  ;;  %v883_v39 = vpop.f32.mrb[28].mxu1 }
 0x21d   : > { %v735_v42 = vpop.f32.mrb[29].mxu0  ;;  %v885_v43 = vpop.f32.mrb[29].mxu1  ;;  %v1079_v46 = vrot.slane %v883_v39, 1 }
 0x21e   : > { %v736_v44 = vpop.f32.mrb[30].mxu0  ;;  %v886_v45 = vpop.f32.mrb[30].mxu1 }
 0x21f   : > { %v1080_v49 = vrot.slane %v886_v45, 1  ;;  %v737_v50 = vpop.f32.mrb[31].mxu0  ;;  %v888_v51 = vpop.f32.mrb[31].mxu1 }
 0x221   : > { %v1081_v53 = vsel %vm1057_vm5, %v1079_v46, %v1080_v49 }
 0x222   : > { %v3080_v56 = vadd.f32 %v1081_v53, %v733_v38 }
 0x224   : > { %v978_v11 = vpop.f32.mrb[32].mxu0 }
 0x225   : > { %v980_v61 = vpop.f32.mrb[33].mxu0  ;;  %v1115_v62 = vrot.slane %v978_v11, 2 }
 0x226   : > { %v981_v3 = vpop.f32.mrb[34].mxu0 }
 0x227   : > { %v1116_v63 = vrot.slane %v981_v3, 2  ;;  %v983_v2 = vpop.f32.mrb[35].mxu0 }
 0x229   : > { %v1117_v48 = vsel %vm1114_vm6, %v1115_v62, %v1116_v63 }
 0x22a   : > { %v1147_v5 = vadd.f32 %v1117_v48, %v3043_v55 }
 0x22c   : > { %v1161_v7 = vadd.f32 %v3090_v1, %v1147_v5  ;;  %v986_v10 = vpop.f32.mrb[36].mxu0 }
 0x22d   : > { %v988_v9 = vpop.f32.mrb[37].mxu0  ;;  %v1118_v16 = vrot.slane %v986_v10, 2 }
 0x22e   : > { %v1169_v55 = vmax.f32 %v1161_v7, 0.0  ;;  %v989_v8 = vpop.f32.mrb[38].mxu0 }
 0x22f   : > { %v1119_v17 = vrot.slane %v989_v8, 2  ;;  %v991_v18 = vpop.f32.mrb[39].mxu0 }
 0x230   : > { %v1222_v26 = vrot.slane %v1169_v55, 7 }
 0x231   : > { %v1120_v40 = vsel %vm1114_vm6, %v1118_v16, %v1119_v17 }
 0x232   : > { %v1148_v41 = vadd.f32 %v1120_v40, %v3052_v60  ;;  %v3117_v57 = vsel %vm388_vm1, %v2789_v35, %v1222_v26  ;;  %v3121_v58 = vsel %vm388_vm1, %v1222_v26, %v2789_v35  ;;  %v3132_v60 = vld [vmem:[%s3477_s4 + $0x80] sm:$0xff]  }
 0x233   : > { %v2416_v12 = vpack.i.bf16 %v3121_v58, %v3117_v57  ;;  %2257 = vmatprep.subr.bf16.mxu0 %v3132_v60 }
 0x234   : > { %v1162_v19 = vadd.f32 %v3090_v1, %v1148_v41  ;;  %v994_v20 = vpop.f32.mrb[40].mxu0  ;;  %2258 = vmatpush3.bf16.msra.mxu0 %v3132_v60 }
 0x235   : > { %2417 = vrot.lane.b32.xlu1 %v2416_v12, %s2600_s14  ;;  %v996_v21 = vpop.f32.mrb[41].mxu0  ;;  %v1121_v24 = vrot.slane %v994_v20, 2  ;;  %2259 = vmatprep.subr.bf16.mxu0 %v3144_v29 }
 0x236   : > { %v1170_v22 = vmax.f32 %v1162_v19, 0.0  ;;  %v997_v23 = vpop.f32.mrb[42].mxu0 }
 0x237   : > { %v1122_v25 = vrot.slane %v997_v23, 2  ;;  %v999_v27 = vpop.f32.mrb[43].mxu0 }
 0x238   : > { %v1225_v30 = vrot.slane %v1170_v22, 7  ;;  %2260 = vmatpush3.bf16.msra.mxu0 %v3144_v29 }
 0x239   : > { %v1123_v31 = vsel %vm1114_vm6, %v1121_v24, %v1122_v25 }
 0x23a   : > { %v1149_v32 = vadd.f32 %v1123_v31, %v3065_v52  ;;  %v3151_v33 = vsel %vm388_vm1, %v2789_v35, %v1225_v30  ;;  %v3155_v37 = vsel %vm388_vm1, %v1225_v30, %v2789_v35 }
 0x23b   : > { %v2426_v38 = vpack.i.bf16 %v3155_v37, %v3151_v33 }
 0x23c   : > { %v1163_v39 = vadd.f32 %v3090_v1, %v1149_v32  ;;  %v1002_v42 = vpop.f32.mrb[44].mxu0 }
 0x23d   : > { %2427 = vrot.lane.b32.xlu1 %v2426_v38, %s2605_s19  ;;  %2422 = vrot.lane.b32.xlu0 %v2426_v38, %s2600_s14  ;;  %v1004_v52 = vpop.f32.mrb[45].mxu0  ;;  %v1124_v45 = vrot.slane %v1002_v42, 2 }
 0x23e   : > { %v1171_v43 = vmax.f32 %v1163_v39, 0.0  ;;  %v1005_v44 = vpop.f32.mrb[46].mxu0 }
 0x23f   : > { %v1125_v46 = vrot.slane %v1005_v44, 2  ;;  %v1007_v49 = vpop.f32.mrb[47].mxu0 }
 0x240   : > { %v1228_v50 = vrot.slane %v1171_v43, 7 }
 0x241   : > { %v1126_v51 = vsel %vm1114_vm6, %v1124_v45, %v1125_v46 }
 0x242   : > { %v1150_v53 = vadd.f32 %v1126_v51, %v3068_v4  ;;  %v3167_v11 = vsel %vm388_vm1, %v2789_v35, %v1228_v50  ;;  %v3171_v61 = vsel %vm388_vm1, %v1228_v50, %v2789_v35 }
 0x243   : > { %v2436_v3 = vpack.i.bf16 %v3171_v61, %v3167_v11 }
 0x244   : > { %v1164_v62 = vadd.f32 %v3090_v1, %v1150_v53  ;;  %v1010_v63 = vpop.f32.mrb[48].mxu0 }
 0x245   : > { %2437 = vrot.lane.b32.xlu1 %v2436_v3, %s2600_s14  ;;  %2432 = vrot.lane.b32.xlu0 %v2436_v3, %s2605_s19  ;;  %v1012_v2 = vpop.f32.mrb[49].mxu0  ;;  %v1127_v5 = vrot.slane %v1010_v63, 2 }
 0x246   : > { %v1172_v4 = vmax.f32 %v1164_v62, 0.0  ;;  %v1013_v48 = vpop.f32.mrb[50].mxu0 }
 0x247   : > { %v1128_v6 = vrot.slane %v1013_v48, 2  ;;  %v1015_v7 = vpop.f32.mrb[51].mxu0 }
 0x248   : > { %v1231_v10 = vrot.slane %v1172_v4, 7 }
 0x249   : > { %v1129_v9 = vsel %vm1114_vm6, %v1127_v5, %v1128_v6 }
 0x24a   : > { %v1151_v55 = vadd.f32 %v1129_v9, %v3071_v15  ;;  %v3182_v8 = vsel %vm388_vm1, %v2789_v35, %v1231_v10  ;;  %v3186_v16 = vsel %vm388_vm1, %v1231_v10, %v2789_v35  ;;  %v3196_v15 = vld [vmem:[%s3477_s4 + $0x30] sm:$0xff]  }
 0x24b   : > { %v2446_v17 = vpack.i.bf16 %v3186_v16, %v3182_v8  ;;  %2221 = vmatprep.subr.bf16.mxu1 %v3196_v15 }
 0x24c   : > { %v1165_v18 = vadd.f32 %v3090_v1, %v1151_v55  ;;  %v1018_v26 = vpop.f32.mrb[52].mxu0 }
 0x24d   : > { %2447 = vrot.lane.b32.xlu1 %v2446_v17, %s2605_s19  ;;  %2442 = vrot.lane.b32.xlu0 %v2446_v17, %s2600_s14  ;;  %v1020_v40 = vpop.f32.mrb[53].mxu0  ;;  %v1130_v13 = vrot.slane %v1018_v26, 2 }
 0x24e   : > { %v1173_v41 = vmax.f32 %v1165_v18, 0.0  ;;  %v1021_v12 = vpop.f32.mrb[54].mxu0 }
 0x24f   : > { %v1131_v19 = vrot.slane %v1021_v12, 2  ;;  %v1023_v20 = vpop.f32.mrb[55].mxu0 }
 0x250   : > { %v1234_v21 = vrot.slane %v1173_v41, 7 }
 0x251   : > { %v1132_v22 = vsel %vm1114_vm6, %v1130_v13, %v1131_v19 }
 0x252   : > { %v1152_v23 = vadd.f32 %v1132_v22, %v3074_v54  ;;  %v3203_v24 = vsel %vm388_vm1, %v2789_v35, %v1234_v21  ;;  %v3207_v25 = vsel %vm388_vm1, %v1234_v21, %v2789_v35 }
 0x253   : > { %v2456_v27 = vpack.i.bf16 %v3207_v25, %v3203_v24 }
 0x254   : > { %v1166_v28 = vadd.f32 %v3090_v1, %v1152_v23  ;;  %v1026_v30 = vpop.f32.mrb[56].mxu0 }
 0x255   : > { %2457 = vrot.lane.b32.xlu1 %v2456_v27, %s2600_s14  ;;  %2452 = vrot.lane.b32.xlu0 %v2456_v27, %s2605_s19  ;;  %v1028_v31 = vpop.f32.mrb[57].mxu0  ;;  %v1133_v38 = vrot.slane %v1026_v30, 2 }
 0x256   : > { %v1174_v54 = vmax.f32 %v1166_v28, 0.0  ;;  %v1029_v32 = vpop.f32.mrb[58].mxu0 }
 0x257   : > { %v1134_v39 = vrot.slane %v1029_v32, 2  ;;  %v1031_v42 = vpop.f32.mrb[59].mxu0 }
 0x258   : > { %v1237_v52 = vrot.slane %v1174_v54, 7 }
 0x259   : > { %v1135_v43 = vsel %vm1114_vm6, %v1133_v38, %v1134_v39 }
 0x25a   : > { %v1153_v44 = vadd.f32 %v1135_v43, %v3077_v59  ;;  %v3218_v45 = vsel %vm388_vm1, %v2789_v35, %v1237_v52  ;;  %v3222_v46 = vsel %vm388_vm1, %v1237_v52, %v2789_v35 }
 0x25b   : > { %v2466_v49 = vpack.i.bf16 %v3222_v46, %v3218_v45 }
 0x25c   : > { %v1167_v50 = vadd.f32 %v3090_v1, %v1153_v44  ;;  %v1034_v51 = vpop.f32.mrb[60].mxu0  ;;  %v2531_v44 = vld [vmem:[%s3477_s4 + $0x38] sm:$0xff]  }
 0x25d   : > { %2467 = vrot.lane.b32.xlu1 %v2466_v49, %s2605_s19  ;;  %2462 = vrot.lane.b32.xlu0 %v2466_v49, %s2600_s14  ;;  %v1036_v53 = vpop.f32.mrb[61].mxu0  ;;  %v1136_v62 = vrot.slane %v1034_v51, 2 }
 0x25e   : > { %v1175_v59 = vmax.f32 %v1167_v50, 0.0  ;;  %v1037_v3 = vpop.f32.mrb[62].mxu0 }
 0x25f   : > { %v1137_v63 = vrot.slane %v1037_v3, 2  ;;  %v1039_v2 = vpop.f32.mrb[63].mxu0 }
 0x260   : > { %v1240_v4 = vrot.slane %v1175_v59, 7 }
 0x261   : > { %v1138_v48 = vsel %vm1114_vm6, %v1136_v62, %v1137_v63 }
 0x262   : > { %v1154_v5 = vadd.f32 %v1138_v48, %v3080_v56  ;;  %v3233_v6 = vsel %vm388_vm1, %v2789_v35, %v1240_v4  ;;  %v3237_v7 = vsel %vm388_vm1, %v1240_v4, %v2789_v35  ;;  %v2533_v4 = vld [vmem:[%s3477_s4 + $0x48] sm:$0xff]  }
 0x263   : > { %v2476_v10 = vpack.i.bf16 %v3237_v7, %v3233_v6 }
 0x264   : > { %v1168_v9 = vadd.f32 %v3090_v1, %v1154_v5 }
 0x265   : > { %2477 = vrot.lane.b32.xlu1 %v2476_v10, %s2600_s14  ;;  %2472 = vrot.lane.b32.xlu0 %v2476_v10, %s2605_s19 }
 0x266   : > { %v1176_v55 = vmax.f32 %v1168_v9, 0.0 }
 0x268   : > { %v1243_v17 = vrot.slane %v1176_v55, 7 }
 0x26a   : > { %v1244_v56 = vsel %vm388_vm1, %v2789_v35, %v1243_v17  ;;  %v1245_v18 = vsel %vm388_vm1, %v1243_v17, %v2789_v35 }
 0x26b   : > { %v2486_v26 = vpack.i.bf16 %v1245_v18, %v1244_v56 }
 0x26d   : > { %2487 = vrot.lane.b32.xlu1 %v2486_v26, %s2605_s19  ;;  %2482 = vrot.lane.b32.xlu0 %v2486_v26, %s2600_s14  ;;  %s2150_s14 = sshll.u32 %s2665_s25, 10  ;;  %s3432_s25 = scalar_lea.sflag [#allocation3], %s257_s17 }
 0x26e   : > { %s3422_s11 = scalar_lea.hbm %s3479_s6, %s2150_s14 }
 0x271   : > { %1336 = vrot.lane.b32.xlu0 %v2602_v34, %s2605_s19 }
 0x2a7   : > { %v2418_v1 = vpop.permute.xlu1 %2417 }
 0x2a8   : > { %v2420_v40 = vunpack.i.h.bf16 %v2418_v1  ;;  %v2419_v41 = vunpack.i.l.bf16 %v2418_v1 }
 0x2aa   : > { %v1354_v20 = vsel %vm315_vm0, 0.0, %v2420_v40  ;;  %v1353_v21 = vsel %vm315_vm0, 0.0, %v2419_v41  ;;  %v2535_v40 = vld [vmem:[%s3477_s4 + $0x58] sm:$0xff]  }
 0x2af   : > { %v2428_v12 = vpop.permute.xlu1 %2427  ;;  %v2423_v23 = vpop.permute.xlu0 %2422 }
 0x2b0   : > { %v2430_v13 = vunpack.i.h.bf16 %v2428_v12  ;;  %v2429_v19 = vunpack.i.l.bf16 %v2428_v12  ;;  %v2425_v28 = vunpack.i.h.bf16 %v2423_v23  ;;  %v2424_v34 = vunpack.i.l.bf16 %v2423_v23 }
 0x2b2   : > { %v1371_v35 = vsel %vm1369_vm7, %v1354_v20, %v2430_v13  ;;  %v1370_v22 = vsel %vm1369_vm7, %v1353_v21, %v2429_v19  ;;  %v1356_v32 = vsel %vm315_vm0, %v3121_v58, %v2425_v28  ;;  %v1355_v38 = vsel %vm315_vm0, %v3117_v57, %v2424_v34  ;;  %v2532_v58 = vld [vmem:[%s3477_s4 + $0x40] sm:$0xff]  }
 0x2b3   : > { %v3256_v27 = vpack.c.bf16 %v1371_v35, %v1370_v22 }
 0x2b5   : > { %2205 = vmatprep.mubr.msk.bf16.mxu1 %vm538_vm4, %v3256_v27  ;;  %2261 = vmatprep.mubr.msk.bf16.mxu0 %vm538_vm4, %v3256_v27 }
 0x2b7   : > { %v2433_v30 = vpop.permute.xlu0 %2432  ;;  %v2438_v39 = vpop.permute.xlu1 %2437 }
 0x2b8   : > { %v2435_v31 = vunpack.i.h.bf16 %v2433_v30  ;;  %v2434_v54 = vunpack.i.l.bf16 %v2433_v30  ;;  %v2440_v49 = vunpack.i.h.bf16 %v2438_v39  ;;  %v2439_v50 = vunpack.i.l.bf16 %v2438_v39 }
 0x2ba   : > { %v1373_v42 = vsel %vm1369_vm7, %v1356_v32, %v2435_v31  ;;  %v1372_v52 = vsel %vm1369_vm7, %v1355_v38, %v2434_v54  ;;  %v1358_v59 = vsel %vm315_vm0, %v3155_v37, %v2440_v49  ;;  %v1357_v3 = vsel %vm315_vm0, %v3151_v33, %v2439_v50  ;;  %v2534_v37 = vld [vmem:[%s3477_s4 + $0x50] sm:$0xff]  }
 0x2bb   : > { %v3268_v43 = vpack.c.bf16 %v1373_v42, %v1372_v52 }
 0x2bd   : > { %2206 = vmatmul.mubr.msk.bf16.vlgmr.msra.gmra.mrb[32].mxu1 %vm538_vm4, %v3268_v43  ;;  %2262 = vmatmul.mubr.msk.bf16.vlgmr.msra.gmra.mrb[64].mxu0 %vm538_vm4, %v3268_v43 }
 0x2be   : > { %2222 = vmatpush3.bf16.msra.mxu1 %v3196_v15 }
 0x2bf   : > { %v2448_v57 = vpop.permute.xlu1 %2447  ;;  %2223 = vmatprep.subr.bf16.mxu1 %v2531_v44  ;;  %v2443_v2 = vpop.permute.xlu0 %2442 }
 0x2c0   : > { %v2450_v51 = vunpack.i.h.bf16 %v2448_v57  ;;  %v2449_v53 = vunpack.i.l.bf16 %v2448_v57  ;;  %v2445_v48 = vunpack.i.h.bf16 %v2443_v2  ;;  %v2444_v5 = vunpack.i.l.bf16 %v2443_v2 }
 0x2c2   : > { %v1375_v62 = vsel %vm1369_vm7, %v1358_v59, %v2450_v51  ;;  %v1374_v63 = vsel %vm1369_vm7, %v1357_v3, %v2449_v53  ;;  %2224 = vmatpush3.bf16.msra.mxu1 %v2531_v44  ;;  %v1360_v55 = vsel %vm315_vm0, %v3171_v61, %v2445_v48  ;;  %v1359_v17 = vsel %vm315_vm0, %v3167_v11, %v2444_v5 }
 0x2c3   : > { %v3287_v15 = vpack.c.bf16 %v1375_v62, %v1374_v63  ;;  %2225 = vmatprep.subr.bf16.mxu1 %v2532_v58 }
 0x2c5   : > { %2209 = vmatprep.mubr.msk.bf16.mxu1 %vm538_vm4, %v3287_v15  ;;  %2265 = vmatprep.mubr.msk.bf16.mxu0 %vm538_vm4, %v3287_v15 }
 0x2c6   : > { %2226 = vmatpush3.bf16.msra.mxu1 %v2532_v58 }
 0x2c7   : > { %v2453_v33 = vpop.permute.xlu0 %2452  ;;  %2227 = vmatprep.subr.bf16.mxu1 %v2533_v4  ;;  %v2458_v56 = vpop.permute.xlu1 %2457 }
 0x2c8   : > { %v2455_v10 = vunpack.i.h.bf16 %v2453_v33  ;;  %v2454_v9 = vunpack.i.l.bf16 %v2453_v33  ;;  %v2460_v41 = vunpack.i.h.bf16 %v2458_v56  ;;  %v2459_v12 = vunpack.i.l.bf16 %v2458_v56 }
 0x2ca   : > { %v1377_v18 = vsel %vm1369_vm7, %v1360_v55, %v2455_v10  ;;  %v1376_v26 = vsel %vm1369_vm7, %v1359_v17, %v2454_v9  ;;  %2228 = vmatpush3.bf16.msra.mxu1 %v2533_v4  ;;  %v1362_v19 = vsel %vm315_vm0, %v3186_v16, %v2460_v41  ;;  %v1361_v20 = vsel %vm315_vm0, %v3182_v8, %v2459_v12 }
 0x2cb   : > { %v1389_v1 = vpack.c.bf16 %v1377_v18, %v1376_v26  ;;  %2229 = vmatprep.subr.bf16.mxu1 %v2534_v37 }
 0x2cd   : > { %2210 = vmatmul.mubr.msk.bf16.gmra.mrb[36].mxu1 %vm538_vm4, %v1389_v1  ;;  %2266 = vmatmul.mubr.msk.bf16.gmra.mrb[68].mxu0 %vm538_vm4, %v1389_v1 }
 0x2ce   : > { %2230 = vmatpush3.bf16.msra.mxu1 %v2534_v37 }
 0x2cf   : > { %v2468_v11 = vpop.permute.xlu1 %2467  ;;  %2231 = vmatprep.subr.bf16.mxu1 %v2535_v40  ;;  %v2463_v22 = vpop.permute.xlu0 %2462 }
 0x2d0   : > { %v2470_v61 = vunpack.i.h.bf16 %v2468_v11  ;;  %v2469_v13 = vunpack.i.l.bf16 %v2468_v11  ;;  %v2465_v28 = vunpack.i.h.bf16 %v2463_v22  ;;  %v2464_v34 = vunpack.i.l.bf16 %v2463_v22 }
 0x2d2   : > { %v1379_v21 = vsel %vm1369_vm7, %v1362_v19, %v2470_v61  ;;  %v1378_v35 = vsel %vm1369_vm7, %v1361_v20, %v2469_v13  ;;  %2232 = vmatpush3.bf16.msra.mxu1 %v2535_v40  ;;  %v1364_v16 = vsel %vm315_vm0, %v3207_v25, %v2465_v28  ;;  %v1363_v8 = vsel %vm315_vm0, %v3203_v24, %v2464_v34 }
 0x2d3   : > { %v1390_v23 = vpack.c.bf16 %v1379_v21, %v1378_v35  ;;  %2277 = vmatprep.subr.bf16.mxu1 %v3057_v36 }
 0x2d5   : > { %2213 = vmatprep.mubr.msk.bf16.mxu1 %vm538_vm4, %v1390_v23 }
 0x2d7   : > { %v2473_v30 = vpop.permute.xlu0 %2472  ;;  %v2478_v32 = vpop.permute.xlu1 %2477 }
 0x2d8   : > { %v2475_v31 = vunpack.i.h.bf16 %v2473_v30  ;;  %v2474_v54 = vunpack.i.l.bf16 %v2473_v30  ;;  %v2480_v52 = vunpack.i.h.bf16 %v2478_v32  ;;  %v2479_v44 = vunpack.i.l.bf16 %v2478_v32 }
 0x2da   : > { %v1381_v38 = vsel %vm1369_vm7, %v1364_v16, %v2475_v31  ;;  %v1380_v39 = vsel %vm1369_vm7, %v1363_v8, %v2474_v54  ;;  %v1366_v25 = vsel %vm315_vm0, %v3222_v46, %v2480_v52  ;;  %v1365_v24 = vsel %vm315_vm0, %v3218_v45, %v2479_v44 }
 0x2db   : > { %v1391_v42 = vpack.c.bf16 %v1381_v38, %v1380_v39 }
 0x2dd   : > { %2214 = vmatmul.mubr.msk.bf16.gmra.mrb[40].mxu1 %vm538_vm4, %v1391_v42 }
 0x2df   : > { %v2488_v49 = vpop.permute.xlu1 %2487  ;;  %v2483_v50 = vpop.permute.xlu0 %2482 }
 0x2e0   : > { %v2490_v57 = vunpack.i.h.bf16 %v2488_v49  ;;  %v2489_v58 = vunpack.i.l.bf16 %v2488_v49  ;;  %v2485_v51 = vunpack.i.h.bf16 %v2483_v50  ;;  %v2484_v53 = vunpack.i.l.bf16 %v2483_v50  ;;  %v3379_v49 = vld [vmem:[%s3478_s5] ss:$0 sm:$0xff] }
 0x2e2   : > { %v1383_v59 = vsel %vm1369_vm7, %v1366_v25, %v2490_v57  ;;  %v1382_v3 = vsel %vm1369_vm7, %v1365_v24, %v2489_v58  ;;  %v1367_v62 = vsel %vm315_vm0, %v3233_v6, %v2484_v53  ;;  %v1368_v63 = vsel %vm315_vm0, %v3237_v7, %v2485_v51 }
 0x2e3   : > { %v1392_v2 = vpack.c.bf16 %v1383_v59, %v1382_v3  ;;  %v1337_v4 = vpop.permute.xlu0 %1336 }
 0x2e4   : > { %v1384_v48 = vsel %vm1369_vm7, %v1367_v62, %v1337_v4  ;;  %v1385_v5 = vsel %vm1369_vm7, %v1368_v63, %v1337_v4 }
 0x2e5   : > { %v1393_v46 = vpack.c.bf16 %v1385_v5, %v1384_v48  ;;  %2217 = vmatprep.mubr.msk.bf16.mxu1 %vm538_vm4, %v1392_v2 }
 0x2e7   : > { %2218 = vmatmul.mubr.msk.bf16.gmra.mrb[44].mxu1 %vm538_vm4, %v1393_v46 }
 0x2e8   : > { %2233 = vmatprep.mubr.msk.bf16.mxu1 %vm538_vm4, %v3256_v27 }
 0x2ef   : > { %2234 = vmatmul.mubr.msk.bf16.vlgmr.msra.gmra.mrb[48].mxu1 %vm538_vm4, %v3268_v43 }
 0x2f0   : > { %2283 = vmatpush3.bf16.msra.mxu1 %v3057_v36  ;;  %2237 = vmatprep.mubr.msk.bf16.mxu1 %vm538_vm4, %v3287_v15 }
 0x2f1   : > { %2278 = vmatprep.subr.bf16.mxu1 %v3085_v0 }
 0x2f4   : > { %2284 = vmatpush3.bf16.msra.mxu1 %v3085_v0 }
 0x2f5   : > { %2279 = vmatprep.subr.bf16.mxu1 %v3099_v47 }
 0x2f7   : > { %2238 = vmatmul.mubr.msk.bf16.gmra.mrb[52].mxu1 %vm538_vm4, %v1389_v1 }
 0x2f8   : > { %2241 = vmatprep.mubr.msk.bf16.mxu1 %vm538_vm4, %v1390_v23  ;;  %2285 = vmatpush3.bf16.msra.mxu1 %v3099_v47 }
 0x2f9   : > { %2280 = vmatprep.subr.bf16.mxu1 %v3110_v14 }
 0x2fc   : > { %2286 = vmatpush3.bf16.msra.mxu1 %v3110_v14 }
 0x2fd   : > { %2281 = vmatprep.subr.bf16.mxu1 %v3132_v60 }
 0x2ff   : > { %2242 = vmatmul.mubr.msk.bf16.gmra.mrb[56].mxu1 %vm538_vm4, %v1391_v42 }
 0x300   : > { %2245 = vmatprep.mubr.msk.bf16.mxu1 %vm538_vm4, %v1392_v2  ;;  %2287 = vmatpush3.bf16.msra.mxu1 %v3132_v60 }
 0x301   : > { %2282 = vmatprep.subr.bf16.mxu1 %v3144_v29 }
 0x304   : > { %2288 = vmatpush3.bf16.msra.mxu1 %v3144_v29 }
 0x307   : > { %2246 = vmatmul.mubr.msk.bf16.gmra.mrb[60].mxu1 %vm538_vm4, %v1393_v46 }
 0x308   : > { %2269 = vmatprep.mubr.msk.bf16.mxu1 %vm538_vm4, %v1390_v23 }
 0x30f   : > { %2270 = vmatmul.mubr.msk.bf16.vlgmr.msra.gmra.mrb[64].mxu1 %vm538_vm4, %v1391_v42 }
 0x310   : > { %2273 = vmatprep.mubr.msk.bf16.mxu1 %vm538_vm4, %v1392_v2 }
 0x317   : > { %2274 = vmatmul.mubr.msk.bf16.gmra.mrb[68].mxu1 %vm538_vm4, %v1393_v46 }
 0x390   : > { %v2207_v36 = vpop.f32.mrb[32].mxu1  ;;  %v2263_v0 = vpop.f32.mrb[64].mxu0 }
 0x391   : > { %v1488_v47 = vpop.f32.mrb[33].mxu1  ;;  %v1746_v14 = vpop.f32.mrb[65].mxu0  ;;  %v1884_v6 = vrot.slane %v2263_v0, 2 }
 0x392   : > { %v2208_v45 = vpop.f32.mrb[34].mxu1  ;;  %v2264_v60 = vpop.f32.mrb[66].mxu0  ;;  %v1881_v43 = vrot.slane %v1746_v14, 2 }
 0x393   : > { %v1885_v7 = vrot.slane %v2264_v60, 2  ;;  %v1491_v27 = vpop.f32.mrb[35].mxu1  ;;  %v1749_v29 = vpop.f32.mrb[67].mxu0 }
 0x394   : > { %v1882_v15 = vrot.slane %v1749_v29, 2 }
 0x395   : > { %v1886_v33 = vsel %vm1114_vm6, %v1884_v6, %v1885_v7 }
 0x396   : > { %v1883_v37 = vsel %vm1114_vm6, %v1881_v43, %v1882_v15 }
 0x3a0   : > { %v2211_v10 = vpop.f32.mrb[36].mxu1  ;;  %v2267_v9 = vpop.f32.mrb[68].mxu0 }
 0x3a1   : > { %v1502_v55 = vpop.f32.mrb[37].mxu1  ;;  %v1762_v17 = vpop.f32.mrb[69].mxu0  ;;  %v1890_v26 = vrot.slane %v2267_v9, 2 }
 0x3a2   : > { %v2212_v56 = vpop.f32.mrb[38].mxu1  ;;  %v2268_v18 = vpop.f32.mrb[70].mxu0  ;;  %v1887_v12 = vrot.slane %v1762_v17, 2 }
 0x3a3   : > { %v1891_v1 = vrot.slane %v2268_v18, 2  ;;  %v1505_v40 = vpop.f32.mrb[39].mxu1  ;;  %v1765_v41 = vpop.f32.mrb[71].mxu0 }
 0x3a4   : > { %v1888_v11 = vrot.slane %v1765_v41, 2 }
 0x3a5   : > { %v1892_v61 = vsel %vm1114_vm6, %v1890_v26, %v1891_v1 }
 0x3a6   : > { %v1889_v13 = vsel %vm1114_vm6, %v1887_v12, %v1888_v11 }
 0x3b0   : > { %v2215_v19 = vpop.f32.mrb[40].mxu1 }
 0x3b1   : > { %v1516_v20 = vpop.f32.mrb[41].mxu1 }
 0x3b2   : > { %v2216_v21 = vpop.f32.mrb[42].mxu1 }
 0x3b3   : > { %v1519_v35 = vpop.f32.mrb[43].mxu1 }
 0x3ba   : > { %v3369_v22 = vpop.f32.mrb[44].mxu1 }
 0x3bb   : > { %v3371_v23 = vpop.f32.mrb[45].mxu1 }
 0x3bc   : > { %v2220_v28 = vpop.f32.mrb[46].mxu1 }
 0x3bd   : > { %v1533_v34 = vpop.f32.mrb[47].mxu1 }
 0x3c2   : > { %v2235_v30 = vpop.f32.mrb[48].mxu1 }
 0x3c3   : > { %v1613_v31 = vpop.f32.mrb[49].mxu1  ;;  %v1828_v16 = vrot.slane %v2235_v30, 1 }
 0x3c4   : > { %v2236_v54 = vpop.f32.mrb[50].mxu1  ;;  %v1825_v38 = vrot.slane %v1613_v31, 1 }
 0x3c5   : > { %v1829_v8 = vrot.slane %v2236_v54, 1  ;;  %v1616_v32 = vpop.f32.mrb[51].mxu1 }
 0x3c6   : > { %v1826_v39 = vrot.slane %v1616_v32, 1 }
 0x3c7   : > { %v1830_v42 = vsel %vm1057_vm5, %v1828_v16, %v1829_v8 }
 0x3c8   : > { %v1858_v52 = vadd.f32 %v2207_v36, %v1830_v42  ;;  %v1827_v44 = vsel %vm1057_vm5, %v1825_v38, %v1826_v39 }
 0x3c9   : > { %v1857_v50 = vadd.f32 %v1827_v44, %v1488_v47 }
 0x3ca   : > { %v1914_v57 = vadd.f32 %v1886_v33, %v1858_v52  ;;  %v2239_v58 = vpop.f32.mrb[52].mxu1 }
 0x3cb   : > { %v1913_v51 = vadd.f32 %v1883_v37, %v1857_v50  ;;  %v1629_v53 = vpop.f32.mrb[53].mxu1  ;;  %v1834_v3 = vrot.slane %v2239_v58, 1 }
 0x3cc   : > { %v1928_v25 = vadd.f32 %v3379_v49, %v1914_v57  ;;  %v2240_v24 = vpop.f32.mrb[54].mxu1  ;;  %v1831_v4 = vrot.slane %v1629_v53, 1 }
 0x3cd   : > { %v1927_v59 = vadd.f32 %v3379_v49, %v1913_v51  ;;  %v1835_v62 = vrot.slane %v2240_v24, 1  ;;  %v1632_v63 = vpop.f32.mrb[55].mxu1 }
 0x3ce   : > { %v1936_v2 = vmax.f32 %v1928_v25, 0.0  ;;  %v1832_v48 = vrot.slane %v1632_v63, 1 }
 0x3cf   : > { %v1935_v5 = vmax.f32 %v1927_v59, 0.0  ;;  %v1836_v46 = vsel %vm1057_vm5, %v1834_v3, %v1835_v62 }
 0x3d0   : > { %1944 = vst.msk [vmem:[%s3386_s26 + $0x8] sm:$0xff] %vm315_vm0, %v1936_v2  ;;  %v1860_v36 = vadd.f32 %v2211_v10, %v1836_v46  ;;  %v1833_v0 = vsel %vm1057_vm5, %v1831_v4, %v1832_v48 }
 0x3d1   : > { %1943 = vst.msk [vmem:[%s3386_s26] sm:$0xff] %vm315_vm0, %v1935_v5  ;;  %v1859_v47 = vadd.f32 %v1833_v0, %v1502_v55 }
 0x3d2   : > { %v1916_v14 = vadd.f32 %v1892_v61, %v1860_v36  ;;  %v2243_v45 = vpop.f32.mrb[56].mxu1 }
 0x3d3   : > { %v1915_v60 = vadd.f32 %v1889_v13, %v1859_v47  ;;  %v1645_v6 = vpop.f32.mrb[57].mxu1  ;;  %v1840_v43 = vrot.slane %v2243_v45, 1 }
 0x3d4   : > { %v1930_v7 = vadd.f32 %v3379_v49, %v1916_v14  ;;  %v2244_v27 = vpop.f32.mrb[58].mxu1  ;;  %v1837_v10 = vrot.slane %v1645_v6, 1 }
 0x3d5   : > { %v1929_v29 = vadd.f32 %v3379_v49, %v1915_v60  ;;  %v1841_v15 = vrot.slane %v2244_v27, 1  ;;  %v1648_v33 = vpop.f32.mrb[59].mxu1 }
 0x3d6   : > { %v1938_v37 = vmax.f32 %v1930_v7, 0.0  ;;  %v1838_v9 = vrot.slane %v1648_v33, 1 }
 0x3d7   : > { %v1937_v17 = vmax.f32 %v1929_v29, 0.0  ;;  %v1842_v55 = vsel %vm1057_vm5, %v1840_v43, %v1841_v15 }
 0x3d8   : > { %1946 = vst.msk [vmem:[%s3386_s26 + $0x18] sm:$0xff] %vm315_vm0, %v1938_v37  ;;  %v1862_v56 = vadd.f32 %v2215_v19, %v1842_v55  ;;  %v1839_v18 = vsel %vm1057_vm5, %v1837_v10, %v1838_v9 }
 0x3d9   : > { %1945 = vst.msk [vmem:[%s3386_s26 + $0x10] sm:$0xff] %vm315_vm0, %v1937_v17  ;;  %v1861_v26 = vadd.f32 %v1839_v18, %v1516_v20 }
 0x3da   : > { %v2247_v1 = vpop.f32.mrb[60].mxu1 }
 0x3db   : > { %v1661_v40 = vpop.f32.mrb[61].mxu1  ;;  %v1846_v12 = vrot.slane %v2247_v1, 1 }
 0x3dc   : > { %v2248_v41 = vpop.f32.mrb[62].mxu1  ;;  %v1843_v13 = vrot.slane %v1661_v40, 1 }
 0x3dd   : > { %v1847_v11 = vrot.slane %v2248_v41, 1  ;;  %v1664_v61 = vpop.f32.mrb[63].mxu1 }
 0x3de   : > { %v1844_v21 = vrot.slane %v1664_v61, 1 }
 0x3df   : > { %v1848_v35 = vsel %vm1057_vm5, %v1846_v12, %v1847_v11 }
 0x3e0   : > { %v1864_v28 = vadd.f32 %v3369_v22, %v1848_v35  ;;  %v1845_v34 = vsel %vm1057_vm5, %v1843_v13, %v1844_v21 }
 0x3e1   : > { %v1863_v19 = vadd.f32 %v1845_v34, %v3371_v23 }
 0x3e2   : > { %v2271_v30 = vpop.f32.mrb[64].mxu1 }
 0x3e3   : > { %v1778_v31 = vpop.f32.mrb[65].mxu1  ;;  %v1896_v20 = vrot.slane %v2271_v30, 2 }
 0x3e4   : > { %v2272_v54 = vpop.f32.mrb[66].mxu1  ;;  %v1893_v32 = vrot.slane %v1778_v31, 2 }
 0x3e5   : > { %v1897_v16 = vrot.slane %v2272_v54, 2  ;;  %v1781_v8 = vpop.f32.mrb[67].mxu1 }
 0x3e6   : > { %v1894_v38 = vrot.slane %v1781_v8, 2 }
 0x3e7   : > { %v1898_v39 = vsel %vm1114_vm6, %v1896_v20, %v1897_v16 }
 0x3e8   : > { %v1918_v42 = vadd.f32 %v1898_v39, %v1862_v56  ;;  %v1895_v52 = vsel %vm1114_vm6, %v1893_v32, %v1894_v38 }
 0x3e9   : > { %v1917_v22 = vadd.f32 %v1895_v52, %v1861_v26 }
 0x3ea   : > { %v1932_v44 = vadd.f32 %v3379_v49, %v1918_v42  ;;  %v2275_v50 = vpop.f32.mrb[68].mxu1 }
 0x3eb   : > { %v1931_v23 = vadd.f32 %v3379_v49, %v1917_v22  ;;  %v1794_v57 = vpop.f32.mrb[69].mxu1  ;;  %v1902_v25 = vrot.slane %v2275_v50, 2 }
 0x3ec   : > { %v1940_v58 = vmax.f32 %v1932_v44, 0.0  ;;  %v2276_v51 = vpop.f32.mrb[70].mxu1  ;;  %v1899_v3 = vrot.slane %v1794_v57, 2 }
 0x3ed   : > { %v1939_v53 = vmax.f32 %v1931_v23, 0.0  ;;  %v1903_v24 = vrot.slane %v2276_v51, 2  ;;  %v1797_v59 = vpop.f32.mrb[71].mxu1 }
 0x3ee   : > { %1948 = vst.msk [vmem:[%s3386_s26 + $0x28] sm:$0xff] %vm315_vm0, %v1940_v58  ;;  %v1900_v62 = vrot.slane %v1797_v59, 2 }
 0x3ef   : > { %1947 = vst.msk [vmem:[%s3386_s26 + $0x20] sm:$0xff] %vm315_vm0, %v1939_v53  ;;  %v1904_v63 = vsel %vm1114_vm6, %v1902_v25, %v1903_v24 }
 0x3f0   : > { %v1920_v2 = vadd.f32 %v1904_v63, %v1864_v28  ;;  %v1901_v4 = vsel %vm1114_vm6, %v1899_v3, %v1900_v62 }
 0x3f1   : > { %v1919_v48 = vadd.f32 %v1901_v4, %v1863_v19 }
 0x3f2   : > { %v1934_v5 = vadd.f32 %v3379_v49, %v1920_v2 }
 0x3f3   : > { %v1933_v46 = vadd.f32 %v3379_v49, %v1919_v48 }
 0x3f4   : > { %v1942_v36 = vmax.f32 %v1934_v5, 0.0 }
 0x3f5   : > { %v1941_v0 = vmax.f32 %v1933_v46, 0.0 }
 0x3f6   : > { %1950 = vst.msk [vmem:[%s3386_s26 + $0x38] sm:$0xff] %vm315_vm0, %v1942_v36 }
 0x3f7   : > { %1949 = vst.msk [vmem:[%s3386_s26 + $0x30] sm:$0xff] %vm315_vm0, %v1941_v0 }
 0x3f8   : > { %2549 = shalt.err (!%p2546_p3)
}
 0x3f9   : > { %s2550_s16 = scalar_lea.hbm %s3422_s11, 1024  ;;  %s2554_s19 = scalar_lea.hbm %s3479_s6, 2048 }
 0x3fa   : > { %p2551_p4 = scmp.ne.s32.totalorder %s3422_s11, %s2550_s16  ;;  %p2555_p9 = scmp.lt.u32.totalorder %s3422_s11, %s3479_s6 }
 0x3fb   : > { %p2556_p10 = scmp.lt.u32.totalorder %s2554_s19, %s2550_s16  ;;  %p2558_p12 = scmp.lt.u32.totalorder %s2550_s16, %s3422_s11 }
 0x3fc   : > { %p2552_p7 = pnand %p2551_p4, %p2682_p5 }
 0x3fd   : > { %p2557_p11 = por %p2556_p10, %p2555_p9 }
 0x3fe   : > { %p2553_p8 = pneg %p2552_p7 }
 0x3ff   : > { %p2559_p13 = por %p2558_p12, %p2557_p11 }
 0x401   : > { %p2560_p0 = pnand %p2559_p13, %p2553_p8 }
 0x403   : > { %2563 = shalt.err (!%p2560_p0)
}
 0x404   : > { %s2607_s14 = smov 128   ;;  %s2608_s29 = smov 8  }
 0x405   : > { %2289 = dma.vmem_to_hbm [thread:$0]  (%p2682_p5), %s3424_s28, 1024, %s3422_s11, %s3432_s25, %s2607_s14, %s2607_s14, %s2608_s29  }
 0x406 PF: > { %p2295_p1 = scmp.ge.s32.totalorder %s2598_s24, 2  ;;  %s1980_s10 = sand.u32 1, %s2586_s21  }
 0x407   : > { %s1981_s12 = scalar_lea.sflag [#allocation3], %s1980_s10 }
 0x408   : > { %p2292_p2 = pnand %p2295_p1, %p2686_p6 }
 0x40a   : > { %2581 = dma.done.wait (!%p2292_p2), %s1981_s12, 1024  }
 0x40b   : > { %2583 = vsyncadd (!%p2292_p2), %s1981_s12, 4294966272  ;;  %p16_p3 = scmp.ge.s32.totalorder %s2669_s27, 4   ;;  %s3482_s21 = smov %s2590_s22 }
 0x40c   : > { %s3483_s22 = smov %s2594_s23  ;;  %s3484_s23 = smov %s2680_s30 }
 0x40d   : > { %s3485_s24 = smov %s2669_s27  ;;  %18 = sbr.rel (!%p16_p3) target bundleno = 3 (0x3), region = 82 }
 0x414   :  { %1986 = vsyncpa [#allocation3], 1 }
 0x415   :  { %1988 = vsyncpa [#allocation3 + $0x1], 1 }

</bundles_post_ra>
